<compile_context>
chip_gen: v5e
topology: v5e:2x2
jax: 0.10.0
libtpu: 0.0.40
codegen_flags: <defaults>
</compile_context>

<pallas_src>
import functools

import jax
import jax.numpy as jnp
import numpy as np
from jax.experimental import pallas as pl
from jax.experimental.pallas import tpu as pltpu


_TM = 512                          # row tile of A_hat (output rows per block)
_MAX_TK = 2048                     # max reduction (column) tile of A_hat
_RESIDENT_BYTES = 8 * 1024 * 1024  # make X/H VMEM-resident below this size
_VMEM_LIMIT = 48 * 1024 * 1024     # < v7x 64 MiB physical; fine on v5e/v6e


def _round_up(x, m):
    return (x + m - 1) // m * m


def _pick_tk(n_p):
    """Largest reduction tile in {2048,1024,512} that divides padded n."""
    for tk in (_MAX_TK, 1024, _TM):
        if tk <= n_p and n_p % tk == 0:
            return tk
    return n_p


# ---------------------------------------------------------------------------
# Fused GCN conv kernel:  O = A_hat @ (X @ W) + b   (optional relu)
#   grid = (n_p // tm, n_p // tk); reduction axis (k) is last / "arbitrary".
#   When `scratch` is empty the accumulator is o_ref itself (f32 output path).
# ---------------------------------------------------------------------------
def _gcn_conv_kernel(a_ref, x_ref, w_ref, b_ref, o_ref, *scratch,
                     apply_relu, x_resident, tk):
    acc_ref = scratch[0] if scratch else o_ref
    k = pl.program_id(1)

    @pl.when(k == 0)
    def _():
        acc_ref[...] = jnp.zeros_like(acc_ref)

    if x_resident:
        # Whole feature matrix lives in VMEM (fetched once); slice the k-tile.
        start = pl.multiple_of(k * tk, tk)
        xk = x_ref[pl.ds(start, tk), :]
    else:
        xk = x_ref[...]

    # Feature transform for this k block (recomputed per row tile; MXU is idle
    # in this HBM-bound regime so the extra flops are free).
    h = jnp.dot(xk, w_ref[...], preferred_element_type=jnp.float32)
    acc_ref[...] += jnp.dot(a_ref[...], h.astype(a_ref.dtype),
                            preferred_element_type=jnp.float32)

    @pl.when(k == pl.num_programs(1) - 1)
    def _():
        r = acc_ref[...] + b_ref[...]
        if apply_relu:
            r = jnp.maximum(r, 0.0)
        o_ref[...] = r.astype(o_ref.dtype)


def _gcn_conv(a_hat, x, w, b, *, tk, out_dtype, apply_relu, x_resident):
    n_p = a_hat.shape[0]
    fin = x.shape[1]
    fout = w.shape[1]
    tm = min(_TM, n_p)
    grid = (n_p // tm, n_p // tk)

    if x_resident:
        x_spec = pl.BlockSpec((n_p, fin), lambda i, k: (0, 0))
        x_bytes = x.size * x.dtype.itemsize
    else:
        x_spec = pl.BlockSpec((tk, fin), lambda i, k: (k, 0))
        x_bytes = grid[0] * x.size * x.dtype.itemsize

    # f32 output + no scratch -> accumulate directly into o_ref (frees VMEM,
    # drops the finalize copy).  bf16 output needs the f32 scratch.
    use_scratch = jnp.dtype(out_dtype) != jnp.dtype(jnp.float32)
    scratch = [pltpu.VMEM((tm, fout), jnp.float32)] if use_scratch else []

    kernel = functools.partial(_gcn_conv_kernel, apply_relu=apply_relu,
                               x_resident=x_resident, tk=tk)

    flops = 2 * n_p * n_p * fout + 2 * grid[0] * n_p * fin * fout
    bytes_accessed = (a_hat.size * a_hat.dtype.itemsize
                      + x_bytes
                      + w.size * w.dtype.itemsize
                      + n_p * fout * jnp.dtype(out_dtype).itemsize)

    return pl.pallas_call(
        kernel,
        out_shape=jax.ShapeDtypeStruct((n_p, fout), out_dtype),
        grid_spec=pltpu.PrefetchScalarGridSpec(
            num_scalar_prefetch=0,
            grid=grid,
            in_specs=[pl.BlockSpec((tm, tk), lambda i, k: (i, k)),
                      x_spec,
                      pl.BlockSpec((fin, fout), lambda i, k: (0, 0)),
                      pl.BlockSpec((1, fout), lambda i, k: (0, 0))],
            out_specs=pl.BlockSpec((tm, fout), lambda i, k: (i, 0)),
            scratch_shapes=scratch,
        ),
        compiler_params=pltpu.CompilerParams(
            dimension_semantics=("parallel", "arbitrary"),
            vmem_limit_bytes=_VMEM_LIMIT),
        cost_estimate=pl.CostEstimate(flops=flops, transcendentals=0,
                                      bytes_accessed=bytes_accessed),
    )(a_hat, x, w, b)


# ---------------------------------------------------------------------------
# Full forward
# ---------------------------------------------------------------------------
@jax.jit
def gcn_net_forward(x, edge_index, w1, b1, w2, b2):
    """x: [N, F_in] float32, edge_index: [2, E] int32 (row 0 = src, row 1 = dst)."""
    n, fin = x.shape
    hidden = w1.shape[1]
    out_dim = w2.shape[1]

    # Pad node count only at row-tile granularity; the reduction tile is
    # chosen as a divisor of n_p so it never inflates the padding.
    n_p = _round_up(n, min(_TM, _round_up(n, 256)))
    n_p = _round_up(n_p, 256)
    if n_p >= _TM:
        n_p = _round_up(n_p, _TM)
    tk = _pick_tk(n_p)

    # --- glue: dense normalized adjacency built directly at the padded shape,
    # self-loops folded into the scatter, one normalize+cast pass ---
    idx = jnp.arange(n, dtype=edge_index.dtype)
    src = jnp.concatenate([edge_index[0], idx])
    dst = jnp.concatenate([edge_index[1], idx])
    a = jnp.zeros((n_p, n_p), jnp.float32).at[dst, src].add(1.0)
    deg = jnp.sum(a, axis=1)                      # padded rows have deg 0
    dinv = jnp.where(deg > 0.0, jax.lax.rsqrt(jnp.maximum(deg, 1.0)), 0.0)
    a_hat = (a * dinv[:, None] * dinv[None, :]).astype(jnp.bfloat16)
    # TODO(synk): for a static graph, hoist/cache A_hat across calls; for truly
    # sparse large graphs replace the dense A_hat with a block-sparse /
    # scalar-prefetch formulation that only DMAs nonzero blocks.

    # --- pad feature dims to 128 lanes ---
    fin_p = _round_up(fin, 128)
    hid_p = _round_up(hidden, 128)
    out_p = _round_up(out_dim, 128)

    x_p = jnp.pad(x.astype(jnp.bfloat16), ((0, n_p - n), (0, fin_p - fin)))
    w1_p = jnp.pad(w1.astype(jnp.bfloat16), ((0, fin_p - fin), (0, hid_p - hidden)))
    w2_p = jnp.pad(w2.astype(jnp.bfloat16), ((0, hid_p - hidden), (0, out_p - out_dim)))
    b1_p = jnp.pad(b1.astype(jnp.float32), (0, hid_p - hidden)).reshape(1, hid_p)
    b2_p = jnp.pad(b2.astype(jnp.float32), (0, out_p - out_dim)).reshape(1, out_p)

    x_resident = n_p * fin_p * 2 <= _RESIDENT_BYTES
    h_resident = n_p * hid_p * 2 <= _RESIDENT_BYTES

    # ---- layer 1: relu(A_hat @ (X @ W1) + b1), fused, bf16 out ----
    h = _gcn_conv(a_hat, x_p, w1_p, b1_p, tk=tk, out_dtype=jnp.bfloat16,
                  apply_relu=True, x_resident=x_resident)
    # F.dropout(x, training=self.training): identity in eval mode.
    # TODO(synk): training-mode dropout (random masking) not implemented.

    # ---- layer 2: A_hat @ (H @ W2) + b2, fused, f32 accumulated in o_ref ----
    out_full = _gcn_conv(a_hat, h, w2_p, b2_p, tk=tk, out_dtype=jnp.float32,
                         apply_relu=False, x_resident=h_resident)

    return out_full[:n, :out_dim]


# ---------------------------------------------------------------------------
# Pure-JAX reference (f32) for the self-check
# ---------------------------------------------------------------------------
def _reference(x, edge_index, w1, b1, w2, b2):
    n = x.shape[0]
    a = jnp.zeros((n, n), jnp.float32).at[edge_index[1], edge_index[0]].add(1.0)
    a = a + jnp.eye(n, dtype=jnp.float32)
    dinv = jax.lax.rsqrt(jnp.sum(a, axis=1))
    a_hat = a * dinv[:, None] * dinv[None, :]
    h = jnp.maximum(a_hat @ (x @ w1) + b1[None, :], 0.0)
    return a_hat @ (h @ w2) + b2[None, :]


if __name__ == "__main__":
    # Small synthetic problem: 8 nodes, input_dim=16, hidden_dim=32, output_dim=4.
    num_nodes, input_dim, hidden_dim, output_dim = 8, 16, 32, 4

    key = jax.random.PRNGKey(0)
    kx, kw1, kb1, kw2, kb2 = jax.random.split(key, 5)

    x = jax.random.normal(kx, (num_nodes, input_dim), dtype=jnp.float32)

    # Ring graph (bidirectional edges), deterministic.
    src = np.arange(num_nodes)
    dst = (src + 1) % num_nodes
    edge_index = jnp.asarray(
        np.stack([np.concatenate([src, dst]), np.concatenate([dst, src])]),
        dtype=jnp.int32)

    # Deterministic glorot-ish parameter init (GCNConv: weight [in, out], bias [out]).
    def glorot(k, shape):
        fan_in, fan_out = shape
        lim = (6.0 / (fan_in + fan_out)) ** 0.5
        return jax.random.uniform(k, shape, jnp.float32, -lim, lim)

    w1 = glorot(kw1, (input_dim, hidden_dim))
    b1 = jax.random.normal(kb1, (hidden_dim,), jnp.float32) * 0.01
    w2 = glorot(kw2, (hidden_dim, output_dim))
    b2 = jax.random.normal(kb2, (output_dim,), jnp.float32) * 0.01

    out = jax.block_until_ready(gcn_net_forward(x, edge_index, w1, b1, w2, b2))
    ref = jax.block_until_ready(_reference(x, edge_index, w1, b1, w2, b2))

    # bf16 adjacency/features with f32 accumulation: loosen tolerance vs the f32 ref.
    np.testing.assert_allclose(np.asarray(out), np.asarray(ref), rtol=5e-2, atol=5e-2)

    print("KERNEL_OK")
</pallas_src>

<mosaic_0001>
module attributes {stable_mosaic.version = 11 : i64} {
  func.func @_gcn_conv_kernel(%arg0: i32, %arg1: i32, %arg2: memref<256x256xbf16, #tpu.memory_space<vmem>>, %arg3: memref<256x128xbf16, #tpu.memory_space<vmem>>, %arg4: memref<128x128xbf16, #tpu.memory_space<vmem>>, %arg5: memref<1x128xf32, #tpu.memory_space<vmem>>, %arg6: memref<256x128xbf16, #tpu.memory_space<vmem>>, %arg7: memref<256x128xf32, #tpu.memory_space<vmem>>) attributes {dimension_semantics = [#tpu.dimension_semantics<parallel>, #tpu.dimension_semantics<arbitrary>], iteration_bounds = array<i64: 1, 1>, scalar_prefetch = 0 : i64, scratch_operands = 1 : i64, tpu.core_type = #tpu.core_type<tc>, window_params = [{transform_indices = @transform_0, window_bounds = array<i64: 256, 256>}, {pipeline_mode = #tpu.pipeline_mode<synchronous>, transform_indices = @transform_1, window_bounds = array<i64: 256, 128>}, {pipeline_mode = #tpu.pipeline_mode<synchronous>, transform_indices = @transform_2, window_bounds = array<i64: 128, 128>}, {pipeline_mode = #tpu.pipeline_mode<synchronous>, transform_indices = @transform_3, window_bounds = array<i64: 1, 128>}, {transform_indices = @transform_4, window_bounds = array<i64: 256, 128>}]} {
    %c0_i32 = arith.constant 0 : i32
    %0 = arith.cmpi eq, %arg1, %c0_i32 : i32
    %1 = arith.extui %0 : i1 to i32
    %c0_i32_0 = arith.constant 0 : i32
    %2 = arith.cmpi ne, %1, %c0_i32_0 : i32
    scf.if %2 {
      %cst_12 = arith.constant 0.000000e+00 : f32
      %18 = vector.broadcast %cst_12 : f32 to vector<256x128xf32>
      %c0_13 = arith.constant 0 : index
      %c0_14 = arith.constant 0 : index
      %19 = vector.load %arg7[%c0_13, %c0_14] : memref<256x128xf32, #tpu.memory_space<vmem>>, vector<256x128xf32>
      tpu.vector_store %arg7[%c0_13, %c0_14], %18 {strides = array<i32>} : memref<256x128xf32, #tpu.memory_space<vmem>>, vector<256x128xf32>,
    } else {
    }
    %c256_i32 = arith.constant 256 : i32
    %3 = arith.muli %arg1, %c256_i32 : i32
    %4 = tpu.assume_multiple %3, 256 : i32
    %5 = arith.index_cast %4 : i32 to index
    %c0 = arith.constant 0 : index
    %6 = vector.load %arg3[%5, %c0] : memref<256x128xbf16, #tpu.memory_space<vmem>>, vector<256x128xbf16>
    %c0_1 = arith.constant 0 : index
    %c0_2 = arith.constant 0 : index
    %7 = vector.load %arg4[%c0_1, %c0_2] : memref<128x128xbf16, #tpu.memory_space<vmem>>, vector<128x128xbf16>
    %cst = arith.constant dense<0.000000e+00> : vector<256x128xf32>
    %8 = tpu.matmul %6, %7, %cst {dimension_numbers = #tpu.dot_dimension_numbers<[1], [0], [0], [1], [0, 0, 1, 1], [], []>} : vector<256x128xbf16>, vector<128x128xbf16>, vector<256x128xf32> -> vector<256x128xf32>
    %c0_3 = arith.constant 0 : index
    %c0_4 = arith.constant 0 : index
    %9 = vector.load %arg7[%c0_3, %c0_4] : memref<256x128xf32, #tpu.memory_space<vmem>>, vector<256x128xf32>
    %c0_5 = arith.constant 0 : index
    %c0_6 = arith.constant 0 : index
    %10 = vector.load %arg2[%c0_5, %c0_6] : memref<256x256xbf16, #tpu.memory_space<vmem>>, vector<256x256xbf16>
    %11 = arith.truncf %8 : vector<256x128xf32> to vector<256x128xbf16>
    %cst_7 = arith.constant dense<0.000000e+00> : vector<256x128xf32>
    %12 = tpu.matmul %10, %11, %cst_7 {dimension_numbers = #tpu.dot_dimension_numbers<[1], [0], [0], [1], [0, 0, 1, 1], [], []>} : vector<256x256xbf16>, vector<256x128xbf16>, vector<256x128xf32> -> vector<256x128xf32>
    %13 = arith.addf %9, %12 : vector<256x128xf32>
    %c0_8 = arith.constant 0 : index
    %c0_9 = arith.constant 0 : index
    %14 = vector.load %arg7[%c0_8, %c0_9] : memref<256x128xf32, #tpu.memory_space<vmem>>, vector<256x128xf32>
    tpu.vector_store %arg7[%c0_8, %c0_9], %13 {strides = array<i32>} : memref<256x128xf32, #tpu.memory_space<vmem>>, vector<256x128xf32>,
    %c0_i32_10 = arith.constant 0 : i32
    %15 = arith.cmpi eq, %arg1, %c0_i32_10 : i32
    %16 = arith.extui %15 : i1 to i32
    %c0_i32_11 = arith.constant 0 : i32
    %17 = arith.cmpi ne, %16, %c0_i32_11 : i32
    scf.if %17 {
      %c0_12 = arith.constant 0 : index
      %c0_13 = arith.constant 0 : index
      %18 = vector.load %arg7[%c0_12, %c0_13] : memref<256x128xf32, #tpu.memory_space<vmem>>, vector<256x128xf32>
      %c0_14 = arith.constant 0 : index
      %c0_15 = arith.constant 0 : index
      %19 = vector.load %arg5[%c0_14, %c0_15] : memref<1x128xf32, #tpu.memory_space<vmem>>, vector<1x128xf32>
      %20 = vector.broadcast %19 : vector<1x128xf32> to vector<256x128xf32>
      %21 = arith.addf %18, %20 : vector<256x128xf32>
      %cst_16 = arith.constant 0.000000e+00 : f32
      %22 = vector.broadcast %cst_16 : f32 to vector<256x128xf32>
      %23 = arith.maximumf %21, %22 : vector<256x128xf32>
      %24 = arith.truncf %23 : vector<256x128xf32> to vector<256x128xbf16>
      %c0_17 = arith.constant 0 : index
      %c0_18 = arith.constant 0 : index
      %25 = vector.load %arg6[%c0_17, %c0_18] : memref<256x128xbf16, #tpu.memory_space<vmem>>, vector<256x128xbf16>
      tpu.vector_store %arg6[%c0_17, %c0_18], %24 {strides = array<i32>} : memref<256x128xbf16, #tpu.memory_space<vmem>>, vector<256x128xbf16>,
    } else {
    }
    return
  }
  func.func @transform_0(%arg0: i32, %arg1: i32) -> (i32, i32) {
    %c0_i32 = arith.constant 0 : i32
    return %arg0, %arg1 : i32, i32
  }
  func.func @transform_1(%arg0: i32, %arg1: i32) -> (i32, i32) {
    %c0_i32 = arith.constant 0 : i32
    %c0_i32_0 = arith.constant 0 : i32
    %c0_i32_1 = arith.constant 0 : i32
    return %c0_i32, %c0_i32_0 : i32, i32
  }
  func.func @transform_2(%arg0: i32, %arg1: i32) -> (i32, i32) {
    %c0_i32 = arith.constant 0 : i32
    %c0_i32_0 = arith.constant 0 : i32
    %c0_i32_1 = arith.constant 0 : i32
    return %c0_i32, %c0_i32_0 : i32, i32
  }
  func.func @transform_3(%arg0: i32, %arg1: i32) -> (i32, i32) {
    %c0_i32 = arith.constant 0 : i32
    %c0_i32_0 = arith.constant 0 : i32
    %c0_i32_1 = arith.constant 0 : i32
    return %c0_i32, %c0_i32_0 : i32, i32
  }
  func.func @transform_4(%arg0: i32, %arg1: i32) -> (i32, i32) {
    %c0_i32 = arith.constant 0 : i32
    %c0_i32_0 = arith.constant 0 : i32
    return %arg0, %c0_i32 : i32, i32
  }
}

module attributes {stable_mosaic.version = 11 : i64} {
  func.func @_gcn_conv_kernel(%arg0: i32, %arg1: i32, %arg2: memref<256x256xbf16, #tpu.memory_space<vmem>>, %arg3: memref<256x128xbf16, #tpu.memory_space<vmem>>, %arg4: memref<128x128xbf16, #tpu.memory_space<vmem>>, %arg5: memref<1x128xf32, #tpu.memory_space<vmem>>, %arg6: memref<256x128xf32, #tpu.memory_space<vmem>>) attributes {dimension_semantics = [#tpu.dimension_semantics<parallel>, #tpu.dimension_semantics<arbitrary>], iteration_bounds = array<i64: 1, 1>, scalar_prefetch = 0 : i64, scratch_operands = 0 : i64, tpu.core_type = #tpu.core_type<tc>, window_params = [{transform_indices = @transform_0, window_bounds = array<i64: 256, 256>}, {pipeline_mode = #tpu.pipeline_mode<synchronous>, transform_indices = @transform_1, window_bounds = array<i64: 256, 128>}, {pipeline_mode = #tpu.pipeline_mode<synchronous>, transform_indices = @transform_2, window_bounds = array<i64: 128, 128>}, {pipeline_mode = #tpu.pipeline_mode<synchronous>, transform_indices = @transform_3, window_bounds = array<i64: 1, 128>}, {transform_indices = @transform_4, window_bounds = array<i64: 256, 128>}]} {
    %c0_i32 = arith.constant 0 : i32
    %0 = arith.cmpi eq, %arg1, %c0_i32 : i32
    %1 = arith.extui %0 : i1 to i32
    %c0_i32_0 = arith.constant 0 : i32
    %2 = arith.cmpi ne, %1, %c0_i32_0 : i32
    scf.if %2 {
      %cst_12 = arith.constant 0.000000e+00 : f32
      %18 = vector.broadcast %cst_12 : f32 to vector<256x128xf32>
      %c0_13 = arith.constant 0 : index
      %c0_14 = arith.constant 0 : index
      %19 = vector.load %arg6[%c0_13, %c0_14] : memref<256x128xf32, #tpu.memory_space<vmem>>, vector<256x128xf32>
      tpu.vector_store %arg6[%c0_13, %c0_14], %18 {strides = array<i32>} : memref<256x128xf32, #tpu.memory_space<vmem>>, vector<256x128xf32>,
    } else {
    }
    %c256_i32 = arith.constant 256 : i32
    %3 = arith.muli %arg1, %c256_i32 : i32
    %4 = tpu.assume_multiple %3, 256 : i32
    %5 = arith.index_cast %4 : i32 to index
    %c0 = arith.constant 0 : index
    %6 = vector.load %arg3[%5, %c0] : memref<256x128xbf16, #tpu.memory_space<vmem>>, vector<256x128xbf16>
    %c0_1 = arith.constant 0 : index
    %c0_2 = arith.constant 0 : index
    %7 = vector.load %arg4[%c0_1, %c0_2] : memref<128x128xbf16, #tpu.memory_space<vmem>>, vector<128x128xbf16>
    %cst = arith.constant dense<0.000000e+00> : vector<256x128xf32>
    %8 = tpu.matmul %6, %7, %cst {dimension_numbers = #tpu.dot_dimension_numbers<[1], [0], [0], [1], [0, 0, 1, 1], [], []>} : vector<256x128xbf16>, vector<128x128xbf16>, vector<256x128xf32> -> vector<256x128xf32>
    %c0_3 = arith.constant 0 : index
    %c0_4 = arith.constant 0 : index
    %9 = vector.load %arg6[%c0_3, %c0_4] : memref<256x128xf32, #tpu.memory_space<vmem>>, vector<256x128xf32>
    %c0_5 = arith.constant 0 : index
    %c0_6 = arith.constant 0 : index
    %10 = vector.load %arg2[%c0_5, %c0_6] : memref<256x256xbf16, #tpu.memory_space<vmem>>, vector<256x256xbf16>
    %11 = arith.truncf %8 : vector<256x128xf32> to vector<256x128xbf16>
    %cst_7 = arith.constant dense<0.000000e+00> : vector<256x128xf32>
    %12 = tpu.matmul %10, %11, %cst_7 {dimension_numbers = #tpu.dot_dimension_numbers<[1], [0], [0], [1], [0, 0, 1, 1], [], []>} : vector<256x256xbf16>, vector<256x128xbf16>, vector<256x128xf32> -> vector<256x128xf32>
    %13 = arith.addf %9, %12 : vector<256x128xf32>
    %c0_8 = arith.constant 0 : index
    %c0_9 = arith.constant 0 : index
    %14 = vector.load %arg6[%c0_8, %c0_9] : memref<256x128xf32, #tpu.memory_space<vmem>>, vector<256x128xf32>
    tpu.vector_store %arg6[%c0_8, %c0_9], %13 {strides = array<i32>} : memref<256x128xf32, #tpu.memory_space<vmem>>, vector<256x128xf32>,
    %c0_i32_10 = arith.constant 0 : i32
    %15 = arith.cmpi eq, %arg1, %c0_i32_10 : i32
    %16 = arith.extui %15 : i1 to i32
    %c0_i32_11 = arith.constant 0 : i32
    %17 = arith.cmpi ne, %16, %c0_i32_11 : i32
    scf.if %17 {
      %c0_12 = arith.constant 0 : index
      %c0_13 = arith.constant 0 : index
      %18 = vector.load %arg6[%c0_12, %c0_13] : memref<256x128xf32, #tpu.memory_space<vmem>>, vector<256x128xf32>
      %c0_14 = arith.constant 0 : index
      %c0_15 = arith.constant 0 : index
      %19 = vector.load %arg5[%c0_14, %c0_15] : memref<1x128xf32, #tpu.memory_space<vmem>>, vector<1x128xf32>
      %20 = vector.broadcast %19 : vector<1x128xf32> to vector<256x128xf32>
      %21 = arith.addf %18, %20 : vector<256x128xf32>
      %c0_16 = arith.constant 0 : index
      %c0_17 = arith.constant 0 : index
      %22 = vector.load %arg6[%c0_16, %c0_17] : memref<256x128xf32, #tpu.memory_space<vmem>>, vector<256x128xf32>
      tpu.vector_store %arg6[%c0_16, %c0_17], %21 {strides = array<i32>} : memref<256x128xf32, #tpu.memory_space<vmem>>, vector<256x128xf32>,
    } else {
    }
    return
  }
  func.func @transform_0(%arg0: i32, %arg1: i32) -> (i32, i32) {
    %c0_i32 = arith.constant 0 : i32
    return %arg0, %arg1 : i32, i32
  }
  func.func @transform_1(%arg0: i32, %arg1: i32) -> (i32, i32) {
    %c0_i32 = arith.constant 0 : i32
    %c0_i32_0 = arith.constant 0 : i32
    %c0_i32_1 = arith.constant 0 : i32
    return %c0_i32, %c0_i32_0 : i32, i32
  }
  func.func @transform_2(%arg0: i32, %arg1: i32) -> (i32, i32) {
    %c0_i32 = arith.constant 0 : i32
    %c0_i32_0 = arith.constant 0 : i32
    %c0_i32_1 = arith.constant 0 : i32
    return %c0_i32, %c0_i32_0 : i32, i32
  }
  func.func @transform_3(%arg0: i32, %arg1: i32) -> (i32, i32) {
    %c0_i32 = arith.constant 0 : i32
    %c0_i32_0 = arith.constant 0 : i32
    %c0_i32_1 = arith.constant 0 : i32
    return %c0_i32, %c0_i32_0 : i32, i32
  }
  func.func @transform_4(%arg0: i32, %arg1: i32) -> (i32, i32) {
    %c0_i32 = arith.constant 0 : i32
    %c0_i32_0 = arith.constant 0 : i32
    return %arg0, %c0_i32 : i32, i32
  }
}

</mosaic_0001>

<bundles_post_ra>
// kernel: gcn_net_forward.2
= control target key start
LH: loop header
LB: loop body
LE: loop exit
PB: predicated region body
PF: predicated region fallthrough
CT: control target
= control target key end

     0   :  { %s1792_s2 = inlined_call_operand.vmem [shape: bf16[128,128], index: 2, kind: input, shape index: {}]   ;;  %s1793_s1 = inlined_call_operand.vmem [shape: bf16[256,128], index: 1, kind: input, shape index: {}]   ;;  %s1794_s0 = inlined_call_operand.vmem [shape: bf16[256,256], index: 0, kind: input, shape index: {}]   ;;  %s1795_s3 = inlined_call_operand.vmem [shape: f32[1,128], index: 3, kind: input, shape index: {}]   ;;  %s1796_s4 = inlined_call_operand.vmem [shape: bf16[256,128], index: 4, kind: output, shape index: {}]  }
   0x1   :  { %v1241_v0 = vld [vmem:[%s1792_s2 + $0x38] sm:$0xff]  ;;  %v1240_v1 = vld [vmem:[%s1792_s2 + $0x30] sm:$0xff]  ;;  %v1239_v2 = vld [vmem:[%s1792_s2 + $0x28] sm:$0xff] }
   0x2   :  { %250 = vmatpush.bf16.msra.mxu0 %v1241_v0  ;;  %1369 = vmatpush.bf16.msra.mxu3 %v1241_v0  ;;  %v1238_v3 = vld [vmem:[%s1792_s2 + $0x20] sm:$0xff]  ;;  %v1237_v4 = vld [vmem:[%s1792_s2 + $0x18] sm:$0xff]  ;;  %v1236_v5 = vld [vmem:[%s1792_s2 + $0x10] sm:$0xff] }
   0x3   :  { %v1235_v6 = vld [vmem:[%s1792_s2 + $0x8] sm:$0xff]  ;;  %v1234_v7 = vld [vmem:[%s1792_s2] sm:$0xff]  ;;  %v1220_v12 = vld [vmem:[%s1793_s1 + $0x10] sm:$0xff] }
   0x4   :  { %v1218_v8 = vld [vmem:[%s1793_s1] sm:$0xff]  ;;  %v1219_v10 = vld [vmem:[%s1793_s1 + $0x8] sm:$0xff]  ;;  %v1232_v13 = vld [vmem:[%s1793_s1 + $0x70] sm:$0xff] }
   0x5   :  { %v1230_v9 = vld [vmem:[%s1793_s1 + $0x60] sm:$0xff]  ;;  %v1231_v11 = vld [vmem:[%s1793_s1 + $0x68] sm:$0xff]  ;;  %v1221_v14 = vld [vmem:[%s1793_s1 + $0x18] sm:$0xff] }
   0x6   :  { %251 = vmatpush.bf16.msra.mxu0 %v1240_v1  ;;  %1370 = vmatpush.bf16.msra.mxu3 %v1240_v1  ;;  %v1233_v15 = vld [vmem:[%s1793_s1 + $0x78] sm:$0xff]  ;;  %v1222_v16 = vld [vmem:[%s1793_s1 + $0x20] sm:$0xff]  ;;  %v1223_v17 = vld [vmem:[%s1793_s1 + $0x28] sm:$0xff] }
   0x7   :  { %v1224_v18 = vld [vmem:[%s1793_s1 + $0x30] sm:$0xff]  ;;  %v1225_v19 = vld [vmem:[%s1793_s1 + $0x38] sm:$0xff]  ;;  %v1226_v20 = vld [vmem:[%s1793_s1 + $0x40] sm:$0xff] }
   0x8   :  { %v1227_v25 = vld [vmem:[%s1793_s1 + $0x48] sm:$0xff]  ;;  %v1228_v31 = vld [vmem:[%s1793_s1 + $0x50] sm:$0xff]  ;;  %v1229_v37 = vld [vmem:[%s1793_s1 + $0x58] sm:$0xff] }
   0x9   :  { %v1188_v0 = vld [vmem:[%s1794_s0 + $0xc0] sm:$0xf]  ;;  %v1267_v1 = vld [vmem:[%s1794_s0 + $0xc4] sm:$0xf0] }
   0xa   :  { %252 = vmatpush.bf16.msra.mxu0 %v1239_v2  ;;  %1371 = vmatpush.bf16.msra.mxu3 %v1239_v2 }
   0xe   :  { %253 = vmatpush.bf16.msra.mxu0 %v1238_v3  ;;  %1372 = vmatpush.bf16.msra.mxu3 %v1238_v3  ;;  %v1189_v3 = vor.u32 %v1267_v1, %v1188_v0  ;;  %v1272_v1 = vld [vmem:[%s1794_s0 + $0xf4] sm:$0xf] }
  0x12   :  { %254 = vmatpush.bf16.msra.mxu0 %v1237_v4  ;;  %1373 = vmatpush.bf16.msra.mxu3 %v1237_v4  ;;  %v1092_v4 = vld [vmem:[%s1794_s0] sm:$0xf] }
  0x16   :  { %255 = vmatpush.bf16.msra.mxu0 %v1236_v5  ;;  %1374 = vmatpush.bf16.msra.mxu3 %v1236_v5  ;;  %v1243_v5 = vld [vmem:[%s1794_s0 + $0x4] sm:$0xf0] }
  0x1a   :  { %256 = vmatpush.bf16.msra.mxu0 %v1235_v6  ;;  %1375 = vmatpush.bf16.msra.mxu3 %v1235_v6  ;;  %v1093_v6 = vor.u32 %v1243_v5, %v1092_v4  ;;  %v1148_v4 = vld [vmem:[%s1794_s0 + $0x70] sm:$0xf]  ;;  %v1257_v5 = vld [vmem:[%s1794_s0 + $0x74] sm:$0xf0] }
  0x1e   :  { %257 = vmatpush.bf16.msra.mxu0 %v1234_v7  ;;  %1376 = vmatpush.bf16.msra.mxu3 %v1234_v7 }
  0x21   :  { %258 = vmatmul.bf16.vlgmr.msra.gmra.mxu0 %v1218_v8  ;;  %318 = vmatmul.bf16.vlgmr.msra.gmra.mxu3 %v1230_v9  ;;  %v1196_v8 = vld [vmem:[%s1794_s0 + $0xd0] sm:$0xf]  ;;  %v1269_v9 = vld [vmem:[%s1794_s0 + $0xd4] sm:$0xf0] }
  0x31   :  { %263 = vmatmul.bf16.gmra.mxu0 %v1219_v10  ;;  %323 = vmatmul.bf16.gmra.mxu3 %v1231_v11  ;;  %v1197_v10 = vor.u32 %v1269_v9, %v1196_v8  ;;  %v1149_v8 = vor.u32 %v1257_v5, %v1148_v4 }
  0x41   :  { %268 = vmatmul.bf16.gmra.mxu0 %v1220_v12  ;;  %328 = vmatmul.bf16.gmra.mxu3 %v1232_v13  ;;  %v1100_v12 = vld [vmem:[%s1794_s0 + $0x10] sm:$0xf]  ;;  %v1245_v13 = vld [vmem:[%s1794_s0 + $0x14] sm:$0xf0] }
  0x51   :  { %273 = vmatmul.bf16.gmra.mxu0 %v1221_v14  ;;  %333 = vmatmul.bf16.gmra.mxu3 %v1233_v15  ;;  %v1101_v14 = vor.u32 %v1245_v13, %v1100_v12  ;;  %v1254_v12 = vld [vmem:[%s1794_s0 + $0x64] sm:$0xf]  ;;  %v1142_v13 = vld [vmem:[%s1794_s0 + $0x68] sm:$0xf0] }
  0x61   :  { %278 = vmatmul.bf16.gmra.mxu0 %v1222_v16 }
  0x71   :  { %283 = vmatmul.bf16.gmra.mxu0 %v1223_v17  ;;  %v1204_v17 = vld [vmem:[%s1794_s0 + $0xe0] sm:$0xf] }
  0x81   :  { %288 = vmatmul.bf16.gmra.mxu0 %v1224_v18  ;;  %v1271_v18 = vld [vmem:[%s1794_s0 + $0xe4] sm:$0xf0] }
  0x91   :  { %293 = vmatmul.bf16.gmra.mxu0 %v1225_v19 }
  0x9e   :  { %v259_v21 = vpop.f32.mrf.mxu0 }
  0xa1   :  { %298 = vmatmul.bf16.gmra.mxu0 %v1226_v20  ;;  %v1205_v20 = vor.u32 %v1271_v18, %v1204_v17  ;;  %v1145_v17 = vor.u32 %v1254_v12, %v1142_v13 }
  0xa4   :  { %v319_v24 = vpop.f32.mrf.mxu3 }
  0xa6   :  { %v261_v22 = vpop.f32.mrf.mxu0 }
  0xa7   :  { %v403_v23 = vpack.c.bf16 %v261_v22, %v259_v21  ;;  %v1108_v22 = vld [vmem:[%s1794_s0 + $0x20] sm:$0xf] }
  0xac   :  { %v321_v27 = vpop.f32.mrf.mxu3 }
  0xad   :  { %v415_v49 = vpack.c.bf16 %v321_v27, %v319_v24  ;;  %v1242_v24 = vld [vmem:[%s1794_s0 + $0x4] sm:$0xf] }
  0xae   :  { %v264_v26 = vpop.f32.mrf.mxu0 }
  0xb1   :  { %303 = vmatmul.bf16.gmra.mxu0 %v1227_v25  ;;  %v1094_v25 = vld [vmem:[%s1794_s0 + $0x8] sm:$0xf0] }
  0xb4   :  { %v324_v30 = vpop.f32.mrf.mxu3 }
  0xb6   :  { %v266_v28 = vpop.f32.mrf.mxu0 }
  0xb7   :  { %v404_v29 = vpack.c.bf16 %v266_v28, %v264_v26  ;;  %v1097_v28 = vor.u32 %v1242_v24, %v1094_v25  ;;  %v1164_v24 = vld [vmem:[%s1794_s0 + $0x90] sm:$0xf]  ;;  %v1261_v25 = vld [vmem:[%s1794_s0 + $0x94] sm:$0xf0] }
  0xbc   :  { %v326_v33 = vpop.f32.mrf.mxu3 }
  0xbd   :  { %v416_v48 = vpack.c.bf16 %v326_v33, %v324_v30  ;;  %v1273_v30 = vld [vmem:[%s1794_s0 + $0xf4] sm:$0xf0] }
  0xbe   :  { %v269_v32 = vpop.f32.mrf.mxu0  ;;  %v1249_v33 = vld [vmem:[%s1794_s0 + $0x34] sm:$0xf0] }
  0xc1   :  { %308 = vmatmul.bf16.gmra.mxu0 %v1228_v31 }
  0xc4   :  { %v329_v36 = vpop.f32.mrf.mxu3 }
  0xc6   :  { %v271_v34 = vpop.f32.mrf.mxu0 }
  0xc7   :  { %v405_v35 = vpack.c.bf16 %v271_v34, %v269_v32  ;;  %v1116_v32 = vld [vmem:[%s1794_s0 + $0x30] sm:$0xf]  ;;  %v1244_v34 = vld [vmem:[%s1794_s0 + $0x14] sm:$0xf] }
  0xcc   :  { %v331_v39 = vpop.f32.mrf.mxu3 }
  0xcd   :  { %v417_v46 = vpack.c.bf16 %v331_v39, %v329_v36  ;;  %v1117_v36 = vor.u32 %v1249_v33, %v1116_v32  ;;  %v1190_v39 = vld [vmem:[%s1794_s0 + $0xc8] sm:$0xf0]  ;;  %v1172_v33 = vld [vmem:[%s1794_s0 + $0xa0] sm:$0xf] }
  0xce   :  { %v274_v38 = vpop.f32.mrf.mxu0 }
  0xd1   :  { %313 = vmatmul.bf16.gmra.mxu0 %v1229_v37 }
  0xd4   :  { %v334_v42 = vpop.f32.mrf.mxu3 }
  0xd6   :  { %v276_v40 = vpop.f32.mrf.mxu0 }
  0xd7   :  { %v406_v41 = vpack.c.bf16 %v276_v40, %v274_v38  ;;  %v1266_v38 = vld [vmem:[%s1794_s0 + $0xc4] sm:$0xf] }
  0xd8   :  { %v1193_v40 = vor.u32 %v1266_v38, %v1190_v39 }
  0xdc   :  { %v336_v44 = vpop.f32.mrf.mxu3 }
  0xdd   :  { %v418_v45 = vpack.c.bf16 %v336_v44, %v334_v42  ;;  %v1251_v42 = vld [vmem:[%s1794_s0 + $0x44] sm:$0xf0]  ;;  %v1110_v44 = vld [vmem:[%s1794_s0 + $0x28] sm:$0xf0] }
  0xde   :  { %v279_v43 = vpop.f32.mrf.mxu0 }
  0xdf   :  { %668 = vmatpush.bf16.msra.mxu2 %v418_v45 }
  0xe3   :  { %669 = vmatpush.bf16.msra.mxu2 %v417_v46 }
  0xe6   :  { %v281_v47 = vpop.f32.mrf.mxu0 }
  0xe7   :  { %670 = vmatpush.bf16.msra.mxu2 %v416_v48  ;;  %v407_v60 = vpack.c.bf16 %v281_v47, %v279_v43  ;;  %v1246_v43 = vld [vmem:[%s1794_s0 + $0x24] sm:$0xf]  ;;  %v1268_v47 = vld [vmem:[%s1794_s0 + $0xd4] sm:$0xf] }
  0xeb   :  { %671 = vmatpush.bf16.msra.mxu2 %v415_v49 }
  0xee   :  { %v284_v50 = vpop.f32.mrf.mxu0 }
  0xf6   :  { %v286_v51 = vpop.f32.mrf.mxu0 }
  0xf7   :  { %v408_v59 = vpack.c.bf16 %v286_v51, %v284_v50  ;;  %v1132_v50 = vld [vmem:[%s1794_s0 + $0x50] sm:$0xf]  ;;  %v1253_v51 = vld [vmem:[%s1794_s0 + $0x54] sm:$0xf0] }
  0xfe   :  { %v289_v52 = vpop.f32.mrf.mxu0 }
 0x106   :  { %v291_v53 = vpop.f32.mrf.mxu0 }
 0x107   :  { %v409_v57 = vpack.c.bf16 %v291_v53, %v289_v52  ;;  %v1248_v52 = vld [vmem:[%s1794_s0 + $0x34] sm:$0xf]  ;;  %v1118_v53 = vld [vmem:[%s1794_s0 + $0x38] sm:$0xf0] }
 0x10e   :  { %v294_v54 = vpop.f32.mrf.mxu0 }
 0x116   :  { %v296_v55 = vpop.f32.mrf.mxu0 }
 0x117   :  { %v410_v56 = vpack.c.bf16 %v296_v55, %v294_v54  ;;  %v1133_v54 = vor.u32 %v1253_v51, %v1132_v50  ;;  %v1121_v55 = vor.u32 %v1248_v52, %v1118_v53 }
 0x119   :  { %579 = vmatpush.bf16.msra.mxu1 %v410_v56  ;;  %1377 = vmatpush.bf16.msrb.mxu3 %v410_v56  ;;  %v1270_v56 = vld [vmem:[%s1794_s0 + $0xe4] sm:$0xf] }
 0x11d   :  { %580 = vmatpush.bf16.msra.mxu1 %v409_v57  ;;  %1378 = vmatpush.bf16.msrb.mxu3 %v409_v57  ;;  %v1206_v57 = vld [vmem:[%s1794_s0 + $0xe8] sm:$0xf0] }
 0x11e   :  { %v299_v58 = vpop.f32.mrf.mxu0 }
 0x121   :  { %581 = vmatpush.bf16.msra.mxu1 %v408_v59  ;;  %1379 = vmatpush.bf16.msrb.mxu3 %v408_v59  ;;  %v1140_v59 = vld [vmem:[%s1794_s0 + $0x60] sm:$0xf] }
 0x125   :  { %582 = vmatpush.bf16.msra.mxu1 %v407_v60  ;;  %1380 = vmatpush.bf16.msrb.mxu3 %v407_v60  ;;  %v1255_v60 = vld [vmem:[%s1794_s0 + $0x64] sm:$0xf0] }
 0x126   :  { %v301_v61 = vpop.f32.mrf.mxu0 }
 0x127   :  { %v411_v27 = vpack.c.bf16 %v301_v61, %v299_v58  ;;  %v1209_v58 = vor.u32 %v1270_v56, %v1206_v57  ;;  %v1250_v61 = vld [vmem:[%s1794_s0 + $0x44] sm:$0xf] }
 0x129   :  { %583 = vmatpush.bf16.msra.mxu1 %v406_v41  ;;  %1381 = vmatpush.bf16.msrb.mxu3 %v406_v41  ;;  %v1124_v41 = vld [vmem:[%s1794_s0 + $0x40] sm:$0xf] }
 0x12d   :  { %584 = vmatpush.bf16.msra.mxu1 %v405_v35  ;;  %1382 = vmatpush.bf16.msrb.mxu3 %v405_v35  ;;  %v1102_v35 = vld [vmem:[%s1794_s0 + $0x18] sm:$0xf0] }
 0x12e   :  { %v304_v62 = vpop.f32.mrf.mxu0  ;;  %v1105_v37 = vor.u32 %v1244_v34, %v1102_v35  ;;  %v1263_v34 = vld [vmem:[%s1794_s0 + $0xa4] sm:$0xf0] }
 0x131   :  { %585 = vmatpush.bf16.msra.mxu1 %v404_v29  ;;  %1383 = vmatpush.bf16.msrb.mxu3 %v404_v29  ;;  %v1212_v29 = vld [vmem:[%s1794_s0 + $0xf0] sm:$0xf] }
 0x132   :  { %v1213_v31 = vor.u32 %v1273_v30, %v1212_v29  ;;  %v1258_v30 = vld [vmem:[%s1794_s0 + $0x84] sm:$0xf] }
 0x135   :  { %586 = vmatpush.bf16.msra.mxu1 %v403_v23  ;;  %1384 = vmatpush.bf16.msrb.mxu3 %v403_v23  ;;  %v1247_v23 = vld [vmem:[%s1794_s0 + $0x24] sm:$0xf0] }
 0x136   :  { %v306_v63 = vpop.f32.mrf.mxu0  ;;  %v1109_v26 = vor.u32 %v1247_v23, %v1108_v22 }
 0x137   :  { %v412_v21 = vpack.c.bf16 %v306_v63, %v304_v62  ;;  %v1126_v62 = vld [vmem:[%s1794_s0 + $0x48] sm:$0xf0]  ;;  %v1141_v63 = vor.u32 %v1255_v60, %v1140_v59 }
 0x138   :  { %647 = vmatmul.bf16.vlgmr.msrb.gmra.mxu3 %v1189_v3  ;;  %587 = vmatmul.bf16.vlgmr.msra.gmra.mxu1 %v1093_v6  ;;  %v1129_v0 = vor.u32 %v1250_v61, %v1126_v62  ;;  %v1252_v6 = vld [vmem:[%s1794_s0 + $0x54] sm:$0xf]  ;;  %v1262_v61 = vld [vmem:[%s1794_s0 + $0xa4] sm:$0xf]  ;;  %v1174_v62 = vld [vmem:[%s1794_s0 + $0xa8] sm:$0xf0] }
 0x139   :  { %1385 = vmatpush.bf16.msra.mxu3 %v418_v45  ;;  %v1125_v45 = vor.u32 %v1251_v42, %v1124_v41  ;;  %v1674_v42 = vld [vmem:[%s1795_s3] ss:$0 sm:$0xff] }
 0x13d   :  { %1386 = vmatpush.bf16.msra.mxu3 %v417_v46  ;;  %v1113_v46 = vor.u32 %v1246_v43, %v1110_v44  ;;  %v1260_v43 = vld [vmem:[%s1794_s0 + $0x94] sm:$0xf]  ;;  %v1166_v44 = vld [vmem:[%s1794_s0 + $0x98] sm:$0xf0] }
 0x13e   :  { %v309_v2 = vpop.f32.mrf.mxu0  ;;  %v1169_v50 = vor.u32 %v1260_v43, %v1166_v44 }
 0x141   :  { %1387 = vmatpush.bf16.msra.mxu3 %v416_v48  ;;  %v1198_v48 = vld [vmem:[%s1794_s0 + $0xd8] sm:$0xf0] }
 0x145   :  { %1388 = vmatpush.bf16.msra.mxu3 %v415_v49  ;;  %v1201_v49 = vor.u32 %v1268_v47, %v1198_v48  ;;  %v1265_v47 = vld [vmem:[%s1794_s0 + $0xb4] sm:$0xf0] }
 0x146   :  { %v311_v7 = vpop.f32.mrf.mxu0 }
 0x147   :  { %v413_v19 = vpack.c.bf16 %v311_v7, %v309_v2  ;;  %v1214_v2 = vld [vmem:[%s1794_s0 + $0xf8] sm:$0xf0] }
 0x148   :  { %652 = vmatmul.bf16.gmra.mxu3 %v1197_v10  ;;  %592 = vmatmul.bf16.gmra.mxu1 %v1101_v14  ;;  %v1217_v3 = vor.u32 %v1272_v1, %v1214_v2  ;;  %v1134_v7 = vld [vmem:[%s1794_s0 + $0x58] sm:$0xf0]  ;;  %v1156_v10 = vld [vmem:[%s1794_s0 + $0x80] sm:$0xf] }
 0x149   :  { %v1137_v9 = vor.u32 %v1252_v6, %v1134_v7 }
 0x14e   :  { %v314_v11 = vpop.f32.mrf.mxu0 }
 0x156   :  { %v316_v15 = vpop.f32.mrf.mxu0 }
 0x157   :  { %v414_v16 = vpack.c.bf16 %v316_v15, %v314_v11  ;;  %v1259_v11 = vld [vmem:[%s1794_s0 + $0x84] sm:$0xf0] }
 0x158   :  { %657 = vmatmul.bf16.gmra.mxu3 %v1205_v20  ;;  %597 = vmatmul.bf16.gmra.mxu1 %v1109_v26  ;;  %v1157_v14 = vor.u32 %v1259_v11, %v1156_v10  ;;  %v1256_v20 = vld [vmem:[%s1794_s0 + $0x74] sm:$0xf] }
 0x159   :  { %672 = vmatpush.bf16.msra.mxu2 %v414_v16  ;;  %1389 = vmatpush.bf16.msra.mxu3 %v414_v16 }
 0x15d   :  { %673 = vmatpush.bf16.msra.mxu2 %v413_v19  ;;  %1390 = vmatpush.bf16.msra.mxu3 %v413_v19 }
 0x161   :  { %674 = vmatpush.bf16.msra.mxu2 %v412_v21  ;;  %1391 = vmatpush.bf16.msra.mxu3 %v412_v21  ;;  %v1150_v21 = vld [vmem:[%s1794_s0 + $0x78] sm:$0xf0] }
 0x162   :  { %v1153_v26 = vor.u32 %v1256_v20, %v1150_v21  ;;  %v1264_v20 = vld [vmem:[%s1794_s0 + $0xb4] sm:$0xf]  ;;  %v1182_v21 = vld [vmem:[%s1794_s0 + $0xb8] sm:$0xf0] }
 0x165   :  { %675 = vmatpush.bf16.msra.mxu2 %v411_v27  ;;  %1392 = vmatpush.bf16.msra.mxu3 %v411_v27  ;;  %v1165_v27 = vor.u32 %v1261_v25, %v1164_v24 }
 0x168   :  { %676 = vmatmul.bf16.vlgmr.msra.gmra.mxu2 %v1097_v28  ;;  %662 = vmatmul.bf16.gmra.mxu3 %v1213_v31  ;;  %v1158_v31 = vld [vmem:[%s1794_s0 + $0x88] sm:$0xf0] }
 0x169   :  { %602 = vmatmul.bf16.gmra.mxu1 %v1117_v36  ;;  %v1161_v35 = vor.u32 %v1258_v30, %v1158_v31  ;;  %v1173_v36 = vor.u32 %v1263_v34, %v1172_v33 }
 0x178   :  { %681 = vmatmul.bf16.gmra.mxu2 %v1105_v37  ;;  %736 = vmatmul.bf16.vlgmr.msra.gmra.mxu3 %v1193_v40 }
 0x179   :  { %607 = vmatmul.bf16.gmra.mxu1 %v1125_v45 }
 0x188   :  { %686 = vmatmul.bf16.gmra.mxu2 %v1113_v46  ;;  %741 = vmatmul.bf16.gmra.mxu3 %v1201_v49  ;;  %v1180_v46 = vld [vmem:[%s1794_s0 + $0xb0] sm:$0xf] }
 0x189   :  { %612 = vmatmul.bf16.gmra.mxu1 %v1133_v54  ;;  %v1181_v52 = vor.u32 %v1265_v47, %v1180_v46 }
 0x198   :  { %691 = vmatmul.bf16.gmra.mxu2 %v1121_v55  ;;  %746 = vmatmul.bf16.gmra.mxu3 %v1209_v58 }
 0x199   :  { %617 = vmatmul.bf16.gmra.mxu1 %v1141_v63 }
 0x1a8   :  { %696 = vmatmul.bf16.gmra.mxu2 %v1129_v0  ;;  %751 = vmatmul.bf16.gmra.mxu3 %v1217_v3  ;;  %v1177_v3 = vor.u32 %v1262_v61, %v1174_v62 }
 0x1a9   :  { %622 = vmatmul.bf16.gmra.mxu1 %v1149_v8 }
 0x1b5   :  { %v588_v15 = vpop.f32.mrf.mxu1 }
 0x1b8   :  { %701 = vmatmul.bf16.gmra.mxu2 %v1137_v9 }
 0x1b9   :  { %627 = vmatmul.bf16.gmra.mxu1 %v1157_v14 }
 0x1bb   :  { %v1635_v16 = vpop.f32.mrf.mxu3 }
 0x1bd   :  { %v590_v18 = vpop.f32.mrf.mxu1 }
 0x1c3   :  { %v1637_v19 = vpop.f32.mrf.mxu3 }
 0x1c5   :  { %v593_v22 = vpop.f32.mrf.mxu1 }
 0x1c8   :  { %706 = vmatmul.bf16.gmra.mxu2 %v1145_v17 }
 0x1c9   :  { %632 = vmatmul.bf16.gmra.mxu1 %v1165_v27 }
 0x1cb   :  { %v1645_v23 = vpop.f32.mrf.mxu3 }
 0x1cd   :  { %v595_v28 = vpop.f32.mrf.mxu1 }
 0x1d3   :  { %v1653_v29 = vpop.f32.mrf.mxu3 }
 0x1d5   :  { %v598_v37 = vpop.f32.mrf.mxu1 }
 0x1d8   :  { %711 = vmatmul.bf16.gmra.mxu2 %v1153_v26  ;;  %v1185_v26 = vor.u32 %v1264_v20, %v1182_v21 }
 0x1d9   :  { %637 = vmatmul.bf16.gmra.mxu1 %v1173_v36 }
 0x1db   :  { %v1661_v32 = vpop.f32.mrf.mxu3 }
 0x1dd   :  { %v600_v40 = vpop.f32.mrf.mxu1 }
 0x1e3   :  { %v1669_v39 = vpop.f32.mrf.mxu3 }
 0x1e6   :  { %v603_v56 = vpop.f32.mrf.mxu1 }
 0x1e8   :  { %716 = vmatmul.bf16.gmra.mxu2 %v1161_v35 }
 0x1e9   :  { %642 = vmatmul.bf16.gmra.mxu1 %v1181_v52 }
 0x1eb   :  { %v677_v38 = vpop.f32.mrf.mxu2  ;;  %v1689_v51 = vpop.f32.mrf.mxu3 }
 0x1ec   :  { %v678_v41 = vadd.f32 %v677_v38, %v588_v15 }
 0x1ee   :  { %v860_v48 = vadd.f32 %v1674_v42, %v678_v41  ;;  %v605_v0 = vpop.f32.mrf.mxu1 }
 0x1f0   :  { %v892_v54 = vmax.f32 %v860_v48, 0.0 }
 0x1f3   :  { %v679_v45 = vpop.f32.mrf.mxu2  ;;  %v1695_v59 = vpop.f32.mrf.mxu3 }
 0x1f4   :  { %v680_v49 = vadd.f32 %v679_v45, %v590_v18 }
 0x1f6   :  { %v861_v53 = vadd.f32 %v1674_v42, %v680_v49  ;;  %v608_v12 = vpop.f32.mrf.mxu1 }
 0x1f8   :  { %v893_v55 = vmax.f32 %v861_v53, 0.0  ;;  %721 = vmatmul.bf16.gmra.mxu2 %v1169_v50 }
 0x1fa   :  { %v1277_v57 = vpack.c.bf16 %v893_v55, %v892_v54 }
 0x1fb   :  { %v682_v58 = vpop.f32.mrf.mxu2  ;;  %v737_v4 = vpop.f32.mrf.mxu3 }
 0x1fc   :  { %1278 = vst [vmem:[%s1796_s4] sm:$0xff] %v1277_v57   ;;  %v683_v60 = vadd.f32 %v682_v58, %v593_v22  ;;  %v738_v10 = vadd.f32 %v737_v4, %v1635_v16 }
 0x1fe   :  { %v862_v1 = vadd.f32 %v1674_v42, %v683_v60  ;;  %v884_v14 = vadd.f32 %v1674_v42, %v738_v10  ;;  %v610_v30 = vpop.f32.mrf.mxu1 }
 0x200   :  { %v894_v6 = vmax.f32 %v862_v1, 0.0  ;;  %v916_v18 = vmax.f32 %v884_v14, 0.0 }
 0x203   :  { %v684_v63 = vpop.f32.mrf.mxu2  ;;  %v739_v11 = vpop.f32.mrf.mxu3 }
 0x204   :  { %v685_v2 = vadd.f32 %v684_v63, %v595_v28  ;;  %v740_v13 = vadd.f32 %v739_v11, %v1637_v19 }
 0x206   :  { %v863_v5 = vadd.f32 %v1674_v42, %v685_v2  ;;  %v885_v15 = vadd.f32 %v1674_v42, %v740_v13  ;;  %v613_v45 = vpop.f32.mrf.mxu1 }
 0x208   :  { %v895_v7 = vmax.f32 %v863_v5, 0.0  ;;  %726 = vmatmul.bf16.gmra.mxu2 %v1177_v3  ;;  %v917_v22 = vmax.f32 %v885_v15, 0.0 }
 0x20a   :  { %v1282_v8 = vpack.c.bf16 %v895_v7, %v894_v6  ;;  %v1337_v24 = vpack.c.bf16 %v917_v22, %v916_v18 }
 0x20b   :  { %v687_v9 = vpop.f32.mrf.mxu2  ;;  %v742_v27 = vpop.f32.mrf.mxu3 }
 0x20c   :  { %1354 = vst [vmem:[%s1796_s4 + $0x8] sm:$0xff] %v1282_v8   ;;  %v688_v17 = vadd.f32 %v687_v9, %v598_v37  ;;  %v743_v36 = vadd.f32 %v742_v27, %v1645_v23 }
 0x20d   :  { %1365 = vst [vmem:[%s1796_s4 + $0x60] sm:$0xff] %v1337_v24  }
 0x20e   :  { %v864_v25 = vadd.f32 %v1674_v42, %v688_v17 }
 0x210   :  { %v896_v31 = vmax.f32 %v864_v25, 0.0 }
 0x213   :  { %v689_v16 = vpop.f32.mrf.mxu2  ;;  %v744_v37 = vpop.f32.mrf.mxu3 }
 0x214   :  { %v690_v19 = vadd.f32 %v689_v16, %v600_v40  ;;  %v745_v38 = vadd.f32 %v744_v37, %v1653_v29  ;;  %v886_v40 = vadd.f32 %v1674_v42, %v743_v36 }
 0x216   :  { %v865_v28 = vadd.f32 %v1674_v42, %v690_v19  ;;  %v887_v41 = vadd.f32 %v1674_v42, %v745_v38  ;;  %v918_v44 = vmax.f32 %v886_v40, 0.0 }
 0x218   :  { %v897_v33 = vmax.f32 %v865_v28, 0.0  ;;  %731 = vmatmul.bf16.gmra.mxu2 %v1185_v26  ;;  %v919_v46 = vmax.f32 %v887_v41, 0.0 }
 0x21a   :  { %v1287_v34 = vpack.c.bf16 %v897_v33, %v896_v31  ;;  %v1342_v48 = vpack.c.bf16 %v919_v46, %v918_v44 }
 0x21b   :  { %v692_v35 = vpop.f32.mrf.mxu2  ;;  %v747_v52 = vpop.f32.mrf.mxu3 }
 0x21c   :  { %1355 = vst [vmem:[%s1796_s4 + $0x10] sm:$0xff] %v1287_v34   ;;  %v693_v43 = vadd.f32 %v692_v35, %v603_v56  ;;  %v615_v56 = vpop.f32.mrf.mxu1  ;;  %v748_v57 = vadd.f32 %v747_v52, %v1661_v32 }
 0x21d   :  { %1366 = vst [vmem:[%s1796_s4 + $0x68] sm:$0xff] %v1342_v48  }
 0x21e   :  { %v866_v49 = vadd.f32 %v1674_v42, %v693_v43  ;;  %v888_v61 = vadd.f32 %v1674_v42, %v748_v57 }
 0x220   :  { %v898_v29 = vmax.f32 %v866_v49, 0.0 }
 0x223   :  { %v694_v47 = vpop.f32.mrf.mxu2  ;;  %v749_v58 = vpop.f32.mrf.mxu3 }
 0x224   :  { %v695_v50 = vadd.f32 %v694_v47, %v605_v0  ;;  %v750_v60 = vadd.f32 %v749_v58, %v1669_v39  ;;  %v920_v0 = vmax.f32 %v888_v61, 0.0  ;;  %v618_v7 = vpop.f32.mrf.mxu1 }
 0x226   :  { %v867_v23 = vadd.f32 %v1674_v42, %v695_v50  ;;  %v889_v62 = vadd.f32 %v1674_v42, %v750_v60 }
 0x228   :  { %v899_v53 = vmax.f32 %v867_v23, 0.0  ;;  %v921_v1 = vmax.f32 %v889_v62, 0.0 }
 0x22a   :  { %v1292_v54 = vpack.c.bf16 %v899_v53, %v898_v29  ;;  %v1347_v3 = vpack.c.bf16 %v921_v1, %v920_v0 }
 0x22b   :  { %v697_v55 = vpop.f32.mrf.mxu2  ;;  %v752_v6 = vpop.f32.mrf.mxu3 }
 0x22c   :  { %1356 = vst [vmem:[%s1796_s4 + $0x18] sm:$0xff] %v1292_v54   ;;  %v698_v63 = vadd.f32 %v697_v55, %v608_v12  ;;  %v753_v11 = vadd.f32 %v752_v6, %v1689_v51  ;;  %v620_v15 = vpop.f32.mrf.mxu1 }
 0x22d   :  { %1367 = vst [vmem:[%s1796_s4 + $0x70] sm:$0xff] %v1347_v3  }
 0x22e   :  { %v868_v4 = vadd.f32 %v1674_v42, %v698_v63  ;;  %v890_v14 = vadd.f32 %v1674_v42, %v753_v11 }
 0x230   :  { %v900_v39 = vmax.f32 %v868_v4, 0.0  ;;  %v922_v20 = vmax.f32 %v890_v14, 0.0 }
 0x233   :  { %v699_v2 = vpop.f32.mrf.mxu2  ;;  %v754_v12 = vpop.f32.mrf.mxu3 }
 0x234   :  { %v700_v5 = vadd.f32 %v699_v2, %v610_v30  ;;  %v755_v13 = vadd.f32 %v754_v12, %v1695_v59  ;;  %v623_v26 = vpop.f32.mrf.mxu1 }
 0x236   :  { %v869_v32 = vadd.f32 %v1674_v42, %v700_v5  ;;  %v891_v17 = vadd.f32 %v1674_v42, %v755_v13 }
 0x238   :  { %v901_v8 = vmax.f32 %v869_v32, 0.0  ;;  %v923_v21 = vmax.f32 %v891_v17, 0.0 }
 0x23a   :  { %v1297_v9 = vpack.c.bf16 %v901_v8, %v900_v39  ;;  %v1352_v16 = vpack.c.bf16 %v923_v21, %v922_v20 }
 0x23b   :  { %v702_v10 = vpop.f32.mrf.mxu2 }
 0x23c   :  { %1357 = vst [vmem:[%s1796_s4 + $0x20] sm:$0xff] %v1297_v9   ;;  %v703_v18 = vadd.f32 %v702_v10, %v613_v45  ;;  %v625_v33 = vpop.f32.mrf.mxu1 }
 0x23d   :  { %1368 = vst [vmem:[%s1796_s4 + $0x78] sm:$0xff] %v1352_v16  }
 0x23e   :  { %v870_v24 = vadd.f32 %v1674_v42, %v703_v18 }
 0x240   :  { %v902_v59 = vmax.f32 %v870_v24, 0.0 }
 0x243   :  { %v704_v22 = vpop.f32.mrf.mxu2 }
 0x244   :  { %v705_v25 = vadd.f32 %v704_v22, %v615_v56  ;;  %v628_v43 = vpop.f32.mrf.mxu1 }
 0x246   :  { %v871_v51 = vadd.f32 %v1674_v42, %v705_v25 }
 0x248   :  { %v903_v19 = vmax.f32 %v871_v51, 0.0 }
 0x24a   :  { %v1302_v27 = vpack.c.bf16 %v903_v19, %v902_v59 }
 0x24b   :  { %v707_v28 = vpop.f32.mrf.mxu2 }
 0x24c   :  { %1358 = vst [vmem:[%s1796_s4 + $0x28] sm:$0xff] %v1302_v27   ;;  %v708_v30 = vadd.f32 %v707_v28, %v618_v7  ;;  %v630_v49 = vpop.f32.mrf.mxu1 }
 0x24e   :  { %v872_v34 = vadd.f32 %v1674_v42, %v708_v30 }
 0x250   :  { %v904_v37 = vmax.f32 %v872_v34, 0.0 }
 0x253   :  { %v709_v31 = vpop.f32.mrf.mxu2 }
 0x254   :  { %v710_v35 = vadd.f32 %v709_v31, %v620_v15  ;;  %v633_v54 = vpop.f32.mrf.mxu1 }
 0x256   :  { %v873_v36 = vadd.f32 %v1674_v42, %v710_v35 }
 0x258   :  { %v905_v38 = vmax.f32 %v873_v36, 0.0 }
 0x25a   :  { %v1307_v40 = vpack.c.bf16 %v905_v38, %v904_v37 }
 0x25b   :  { %v712_v41 = vpop.f32.mrf.mxu2 }
 0x25c   :  { %1359 = vst [vmem:[%s1796_s4 + $0x30] sm:$0xff] %v1307_v40   ;;  %v713_v44 = vadd.f32 %v712_v41, %v623_v26  ;;  %v635_v63 = vpop.f32.mrf.mxu1 }
 0x25e   :  { %v874_v46 = vadd.f32 %v1674_v42, %v713_v44 }
 0x260   :  { %v906_v50 = vmax.f32 %v874_v46, 0.0 }
 0x263   :  { %v714_v45 = vpop.f32.mrf.mxu2 }
 0x264   :  { %v715_v47 = vadd.f32 %v714_v45, %v625_v33  ;;  %v638_v5 = vpop.f32.mrf.mxu1 }
 0x266   :  { %v875_v48 = vadd.f32 %v1674_v42, %v715_v47 }
 0x268   :  { %v907_v52 = vmax.f32 %v875_v48, 0.0 }
 0x26a   :  { %v1312_v23 = vpack.c.bf16 %v907_v52, %v906_v50 }
 0x26b   :  { %v717_v29 = vpop.f32.mrf.mxu2 }
 0x26c   :  { %1360 = vst [vmem:[%s1796_s4 + $0x38] sm:$0xff] %v1312_v23   ;;  %v718_v53 = vadd.f32 %v717_v29, %v628_v43  ;;  %v640_v9 = vpop.f32.mrf.mxu1 }
 0x26e   :  { %v876_v56 = vadd.f32 %v1674_v42, %v718_v53 }
 0x270   :  { %v908_v60 = vmax.f32 %v876_v56, 0.0 }
 0x273   :  { %v719_v55 = vpop.f32.mrf.mxu2 }
 0x274   :  { %v720_v57 = vadd.f32 %v719_v55, %v630_v49  ;;  %v643_v18 = vpop.f32.mrf.mxu1 }
 0x276   :  { %v877_v58 = vadd.f32 %v1674_v42, %v720_v57 }
 0x278   :  { %v909_v61 = vmax.f32 %v877_v58, 0.0 }
 0x27a   :  { %v1317_v62 = vpack.c.bf16 %v909_v61, %v908_v60 }
 0x27b   :  { %v722_v0 = vpop.f32.mrf.mxu2 }
 0x27c   :  { %1361 = vst [vmem:[%s1796_s4 + $0x40] sm:$0xff] %v1317_v62   ;;  %v723_v1 = vadd.f32 %v722_v0, %v633_v54  ;;  %v645_v16 = vpop.f32.mrf.mxu1 }
 0x27e   :  { %v878_v3 = vadd.f32 %v1674_v42, %v723_v1 }
 0x280   :  { %v910_v7 = vmax.f32 %v878_v3, 0.0 }
 0x283   :  { %v724_v2 = vpop.f32.mrf.mxu2 }
 0x284   :  { %v725_v4 = vadd.f32 %v724_v2, %v635_v63 }
 0x286   :  { %v879_v6 = vadd.f32 %v1674_v42, %v725_v4 }
 0x288   :  { %v911_v32 = vmax.f32 %v879_v6, 0.0 }
 0x28a   :  { %v1322_v39 = vpack.c.bf16 %v911_v32, %v910_v7 }
 0x28b   :  { %v727_v8 = vpop.f32.mrf.mxu2 }
 0x28c   :  { %1362 = vst [vmem:[%s1796_s4 + $0x48] sm:$0xff] %v1322_v39   ;;  %v728_v10 = vadd.f32 %v727_v8, %v638_v5 }
 0x28e   :  { %v880_v12 = vadd.f32 %v1674_v42, %v728_v10 }
 0x290   :  { %v912_v15 = vmax.f32 %v880_v12, 0.0 }
 0x293   :  { %v729_v11 = vpop.f32.mrf.mxu2 }
 0x294   :  { %v730_v13 = vadd.f32 %v729_v11, %v640_v9 }
 0x296   :  { %v881_v14 = vadd.f32 %v1674_v42, %v730_v13 }
 0x298   :  { %v913_v17 = vmax.f32 %v881_v14, 0.0 }
 0x29a   :  { %v1327_v20 = vpack.c.bf16 %v913_v17, %v912_v15 }
 0x29b   :  { %v732_v21 = vpop.f32.mrf.mxu2 }
 0x29c   :  { %1363 = vst [vmem:[%s1796_s4 + $0x50] sm:$0xff] %v1327_v20   ;;  %v733_v22 = vadd.f32 %v732_v21, %v643_v18 }
 0x29e   :  { %v882_v25 = vadd.f32 %v1674_v42, %v733_v22 }
 0x2a0   :  { %v914_v19 = vmax.f32 %v882_v25, 0.0 }
 0x2a3   :  { %v734_v24 = vpop.f32.mrf.mxu2 }
 0x2a4   :  { %v735_v51 = vadd.f32 %v734_v24, %v645_v16 }
 0x2a6   :  { %v883_v59 = vadd.f32 %v1674_v42, %v735_v51 }
 0x2a8   :  { %v915_v26 = vmax.f32 %v883_v59, 0.0 }
 0x2aa   :  { %v1332_v27 = vpack.c.bf16 %v915_v26, %v914_v19 }
 0x2ac   :  { %1364 = vst [vmem:[%s1796_s4 + $0x58] sm:$0xff] %v1332_v27  }

// kernel: gcn_net_forward.3
= control target key start
LH: loop header
LB: loop body
LE: loop exit
PB: predicated region body
PF: predicated region fallthrough
CT: control target
= control target key end

     0   :  { %s1682_s2 = inlined_call_operand.vmem [shape: bf16[128,128], index: 2, kind: input, shape index: {}]   ;;  %s1683_s1 = inlined_call_operand.vmem [shape: bf16[256,128], index: 1, kind: input, shape index: {}]   ;;  %s1684_s0 = inlined_call_operand.vmem [shape: bf16[256,256], index: 0, kind: input, shape index: {}]   ;;  %s1685_s3 = inlined_call_operand.vmem [shape: f32[1,128], index: 3, kind: input, shape index: {}]   ;;  %s1686_s4 = inlined_call_operand.vmem [shape: f32[256,128], index: 4, kind: output, shape index: {}]  }
   0x1   :  { %v1177_v0 = vld [vmem:[%s1682_s2 + $0x38] sm:$0xff]  ;;  %v1176_v1 = vld [vmem:[%s1682_s2 + $0x30] sm:$0xff]  ;;  %v1175_v2 = vld [vmem:[%s1682_s2 + $0x28] sm:$0xff] }
   0x2   :  { %250 = vmatpush.bf16.msra.mxu0 %v1177_v0  ;;  %1210 = vmatpush.bf16.msra.mxu3 %v1177_v0  ;;  %v1174_v3 = vld [vmem:[%s1682_s2 + $0x20] sm:$0xff]  ;;  %v1173_v4 = vld [vmem:[%s1682_s2 + $0x18] sm:$0xff]  ;;  %v1172_v5 = vld [vmem:[%s1682_s2 + $0x10] sm:$0xff] }
   0x3   :  { %v1171_v6 = vld [vmem:[%s1682_s2 + $0x8] sm:$0xff]  ;;  %v1170_v7 = vld [vmem:[%s1682_s2] sm:$0xff]  ;;  %v1156_v12 = vld [vmem:[%s1683_s1 + $0x10] sm:$0xff] }
   0x4   :  { %v1154_v8 = vld [vmem:[%s1683_s1] sm:$0xff]  ;;  %v1155_v10 = vld [vmem:[%s1683_s1 + $0x8] sm:$0xff]  ;;  %v1168_v13 = vld [vmem:[%s1683_s1 + $0x70] sm:$0xff] }
   0x5   :  { %v1166_v9 = vld [vmem:[%s1683_s1 + $0x60] sm:$0xff]  ;;  %v1167_v11 = vld [vmem:[%s1683_s1 + $0x68] sm:$0xff]  ;;  %v1157_v14 = vld [vmem:[%s1683_s1 + $0x18] sm:$0xff] }
   0x6   :  { %251 = vmatpush.bf16.msra.mxu0 %v1176_v1  ;;  %1211 = vmatpush.bf16.msra.mxu3 %v1176_v1  ;;  %v1169_v15 = vld [vmem:[%s1683_s1 + $0x78] sm:$0xff]  ;;  %v1158_v16 = vld [vmem:[%s1683_s1 + $0x20] sm:$0xff]  ;;  %v1159_v17 = vld [vmem:[%s1683_s1 + $0x28] sm:$0xff] }
   0x7   :  { %v1160_v18 = vld [vmem:[%s1683_s1 + $0x30] sm:$0xff]  ;;  %v1161_v19 = vld [vmem:[%s1683_s1 + $0x38] sm:$0xff]  ;;  %v1162_v20 = vld [vmem:[%s1683_s1 + $0x40] sm:$0xff] }
   0x8   :  { %v1163_v25 = vld [vmem:[%s1683_s1 + $0x48] sm:$0xff]  ;;  %v1164_v31 = vld [vmem:[%s1683_s1 + $0x50] sm:$0xff]  ;;  %v1165_v37 = vld [vmem:[%s1683_s1 + $0x58] sm:$0xff] }
   0x9   :  { %v1124_v0 = vld [vmem:[%s1684_s0 + $0xc0] sm:$0xf]  ;;  %v1203_v1 = vld [vmem:[%s1684_s0 + $0xc4] sm:$0xf0] }
   0xa   :  { %252 = vmatpush.bf16.msra.mxu0 %v1175_v2  ;;  %1212 = vmatpush.bf16.msra.mxu3 %v1175_v2 }
   0xe   :  { %253 = vmatpush.bf16.msra.mxu0 %v1174_v3  ;;  %1213 = vmatpush.bf16.msra.mxu3 %v1174_v3  ;;  %v1125_v3 = vor.u32 %v1203_v1, %v1124_v0  ;;  %v1208_v1 = vld [vmem:[%s1684_s0 + $0xf4] sm:$0xf] }
  0x12   :  { %254 = vmatpush.bf16.msra.mxu0 %v1173_v4  ;;  %1214 = vmatpush.bf16.msra.mxu3 %v1173_v4  ;;  %v1028_v4 = vld [vmem:[%s1684_s0] sm:$0xf] }
  0x16   :  { %255 = vmatpush.bf16.msra.mxu0 %v1172_v5  ;;  %1215 = vmatpush.bf16.msra.mxu3 %v1172_v5  ;;  %v1179_v5 = vld [vmem:[%s1684_s0 + $0x4] sm:$0xf0] }
  0x1a   :  { %256 = vmatpush.bf16.msra.mxu0 %v1171_v6  ;;  %1216 = vmatpush.bf16.msra.mxu3 %v1171_v6  ;;  %v1029_v6 = vor.u32 %v1179_v5, %v1028_v4  ;;  %v1084_v4 = vld [vmem:[%s1684_s0 + $0x70] sm:$0xf]  ;;  %v1193_v5 = vld [vmem:[%s1684_s0 + $0x74] sm:$0xf0] }
  0x1e   :  { %257 = vmatpush.bf16.msra.mxu0 %v1170_v7  ;;  %1217 = vmatpush.bf16.msra.mxu3 %v1170_v7 }
  0x21   :  { %258 = vmatmul.bf16.vlgmr.msra.gmra.mxu0 %v1154_v8  ;;  %318 = vmatmul.bf16.vlgmr.msra.gmra.mxu3 %v1166_v9  ;;  %v1132_v8 = vld [vmem:[%s1684_s0 + $0xd0] sm:$0xf]  ;;  %v1205_v9 = vld [vmem:[%s1684_s0 + $0xd4] sm:$0xf0] }
  0x31   :  { %263 = vmatmul.bf16.gmra.mxu0 %v1155_v10  ;;  %323 = vmatmul.bf16.gmra.mxu3 %v1167_v11  ;;  %v1133_v10 = vor.u32 %v1205_v9, %v1132_v8  ;;  %v1085_v8 = vor.u32 %v1193_v5, %v1084_v4 }
  0x41   :  { %268 = vmatmul.bf16.gmra.mxu0 %v1156_v12  ;;  %328 = vmatmul.bf16.gmra.mxu3 %v1168_v13  ;;  %v1036_v12 = vld [vmem:[%s1684_s0 + $0x10] sm:$0xf]  ;;  %v1181_v13 = vld [vmem:[%s1684_s0 + $0x14] sm:$0xf0] }
  0x51   :  { %273 = vmatmul.bf16.gmra.mxu0 %v1157_v14  ;;  %333 = vmatmul.bf16.gmra.mxu3 %v1169_v15  ;;  %v1037_v14 = vor.u32 %v1181_v13, %v1036_v12  ;;  %v1190_v12 = vld [vmem:[%s1684_s0 + $0x64] sm:$0xf]  ;;  %v1078_v13 = vld [vmem:[%s1684_s0 + $0x68] sm:$0xf0] }
  0x61   :  { %278 = vmatmul.bf16.gmra.mxu0 %v1158_v16 }
  0x71   :  { %283 = vmatmul.bf16.gmra.mxu0 %v1159_v17  ;;  %v1140_v17 = vld [vmem:[%s1684_s0 + $0xe0] sm:$0xf] }
  0x81   :  { %288 = vmatmul.bf16.gmra.mxu0 %v1160_v18  ;;  %v1207_v18 = vld [vmem:[%s1684_s0 + $0xe4] sm:$0xf0] }
  0x91   :  { %293 = vmatmul.bf16.gmra.mxu0 %v1161_v19 }
  0x9e   :  { %v259_v21 = vpop.f32.mrf.mxu0 }
  0xa1   :  { %298 = vmatmul.bf16.gmra.mxu0 %v1162_v20  ;;  %v1141_v20 = vor.u32 %v1207_v18, %v1140_v17  ;;  %v1081_v17 = vor.u32 %v1190_v12, %v1078_v13  ;;  %v1118_v12 = vld [vmem:[%s1684_s0 + $0xb8] sm:$0xf0] }
  0xa4   :  { %v319_v24 = vpop.f32.mrf.mxu3 }
  0xa6   :  { %v261_v22 = vpop.f32.mrf.mxu0 }
  0xa7   :  { %v403_v23 = vpack.c.bf16 %v261_v22, %v259_v21  ;;  %v1044_v22 = vld [vmem:[%s1684_s0 + $0x20] sm:$0xf] }
  0xac   :  { %v321_v27 = vpop.f32.mrf.mxu3 }
  0xad   :  { %v415_v49 = vpack.c.bf16 %v321_v27, %v319_v24  ;;  %v1178_v24 = vld [vmem:[%s1684_s0 + $0x4] sm:$0xf] }
  0xae   :  { %v264_v26 = vpop.f32.mrf.mxu0 }
  0xb1   :  { %303 = vmatmul.bf16.gmra.mxu0 %v1163_v25  ;;  %v1030_v25 = vld [vmem:[%s1684_s0 + $0x8] sm:$0xf0] }
  0xb4   :  { %v324_v30 = vpop.f32.mrf.mxu3 }
  0xb6   :  { %v266_v28 = vpop.f32.mrf.mxu0 }
  0xb7   :  { %v404_v29 = vpack.c.bf16 %v266_v28, %v264_v26  ;;  %v1033_v28 = vor.u32 %v1178_v24, %v1030_v25  ;;  %v1100_v24 = vld [vmem:[%s1684_s0 + $0x90] sm:$0xf]  ;;  %v1197_v25 = vld [vmem:[%s1684_s0 + $0x94] sm:$0xf0] }
  0xbc   :  { %v326_v33 = vpop.f32.mrf.mxu3 }
  0xbd   :  { %v416_v48 = vpack.c.bf16 %v326_v33, %v324_v30  ;;  %v1209_v30 = vld [vmem:[%s1684_s0 + $0xf4] sm:$0xf0] }
  0xbe   :  { %v269_v32 = vpop.f32.mrf.mxu0  ;;  %v1185_v33 = vld [vmem:[%s1684_s0 + $0x34] sm:$0xf0] }
  0xc1   :  { %308 = vmatmul.bf16.gmra.mxu0 %v1164_v31 }
  0xc4   :  { %v329_v36 = vpop.f32.mrf.mxu3 }
  0xc6   :  { %v271_v34 = vpop.f32.mrf.mxu0 }
  0xc7   :  { %v405_v35 = vpack.c.bf16 %v271_v34, %v269_v32  ;;  %v1052_v32 = vld [vmem:[%s1684_s0 + $0x30] sm:$0xf]  ;;  %v1180_v34 = vld [vmem:[%s1684_s0 + $0x14] sm:$0xf] }
  0xcc   :  { %v331_v39 = vpop.f32.mrf.mxu3 }
  0xcd   :  { %v417_v46 = vpack.c.bf16 %v331_v39, %v329_v36  ;;  %v1053_v36 = vor.u32 %v1185_v33, %v1052_v32  ;;  %v1126_v39 = vld [vmem:[%s1684_s0 + $0xc8] sm:$0xf0]  ;;  %v1108_v33 = vld [vmem:[%s1684_s0 + $0xa0] sm:$0xf] }
  0xce   :  { %v274_v38 = vpop.f32.mrf.mxu0 }
  0xd1   :  { %313 = vmatmul.bf16.gmra.mxu0 %v1165_v37 }
  0xd4   :  { %v334_v42 = vpop.f32.mrf.mxu3 }
  0xd6   :  { %v276_v40 = vpop.f32.mrf.mxu0 }
  0xd7   :  { %v406_v41 = vpack.c.bf16 %v276_v40, %v274_v38  ;;  %v1202_v38 = vld [vmem:[%s1684_s0 + $0xc4] sm:$0xf] }
  0xd8   :  { %v1129_v40 = vor.u32 %v1202_v38, %v1126_v39 }
  0xdc   :  { %v336_v44 = vpop.f32.mrf.mxu3 }
  0xdd   :  { %v418_v45 = vpack.c.bf16 %v336_v44, %v334_v42  ;;  %v1187_v42 = vld [vmem:[%s1684_s0 + $0x44] sm:$0xf0]  ;;  %v1046_v44 = vld [vmem:[%s1684_s0 + $0x28] sm:$0xf0] }
  0xde   :  { %v279_v43 = vpop.f32.mrf.mxu0 }
  0xdf   :  { %668 = vmatpush.bf16.msra.mxu2 %v418_v45 }
  0xe3   :  { %669 = vmatpush.bf16.msra.mxu2 %v417_v46 }
  0xe6   :  { %v281_v47 = vpop.f32.mrf.mxu0 }
  0xe7   :  { %670 = vmatpush.bf16.msra.mxu2 %v416_v48  ;;  %v407_v60 = vpack.c.bf16 %v281_v47, %v279_v43  ;;  %v1182_v43 = vld [vmem:[%s1684_s0 + $0x24] sm:$0xf]  ;;  %v1204_v47 = vld [vmem:[%s1684_s0 + $0xd4] sm:$0xf] }
  0xeb   :  { %671 = vmatpush.bf16.msra.mxu2 %v415_v49 }
  0xee   :  { %v284_v50 = vpop.f32.mrf.mxu0 }
  0xf6   :  { %v286_v51 = vpop.f32.mrf.mxu0 }
  0xf7   :  { %v408_v59 = vpack.c.bf16 %v286_v51, %v284_v50  ;;  %v1068_v50 = vld [vmem:[%s1684_s0 + $0x50] sm:$0xf]  ;;  %v1189_v51 = vld [vmem:[%s1684_s0 + $0x54] sm:$0xf0] }
  0xfe   :  { %v289_v52 = vpop.f32.mrf.mxu0 }
 0x106   :  { %v291_v53 = vpop.f32.mrf.mxu0 }
 0x107   :  { %v409_v57 = vpack.c.bf16 %v291_v53, %v289_v52  ;;  %v1184_v52 = vld [vmem:[%s1684_s0 + $0x34] sm:$0xf]  ;;  %v1054_v53 = vld [vmem:[%s1684_s0 + $0x38] sm:$0xf0] }
 0x10e   :  { %v294_v54 = vpop.f32.mrf.mxu0 }
 0x116   :  { %v296_v55 = vpop.f32.mrf.mxu0 }
 0x117   :  { %v410_v56 = vpack.c.bf16 %v296_v55, %v294_v54  ;;  %v1069_v54 = vor.u32 %v1189_v51, %v1068_v50  ;;  %v1057_v55 = vor.u32 %v1184_v52, %v1054_v53 }
 0x119   :  { %579 = vmatpush.bf16.msra.mxu1 %v410_v56  ;;  %1218 = vmatpush.bf16.msrb.mxu3 %v410_v56  ;;  %v1206_v56 = vld [vmem:[%s1684_s0 + $0xe4] sm:$0xf] }
 0x11d   :  { %580 = vmatpush.bf16.msra.mxu1 %v409_v57  ;;  %1219 = vmatpush.bf16.msrb.mxu3 %v409_v57  ;;  %v1142_v57 = vld [vmem:[%s1684_s0 + $0xe8] sm:$0xf0] }
 0x11e   :  { %v299_v58 = vpop.f32.mrf.mxu0 }
 0x121   :  { %581 = vmatpush.bf16.msra.mxu1 %v408_v59  ;;  %1220 = vmatpush.bf16.msrb.mxu3 %v408_v59  ;;  %v1076_v59 = vld [vmem:[%s1684_s0 + $0x60] sm:$0xf] }
 0x125   :  { %582 = vmatpush.bf16.msra.mxu1 %v407_v60  ;;  %1221 = vmatpush.bf16.msrb.mxu3 %v407_v60  ;;  %v1191_v60 = vld [vmem:[%s1684_s0 + $0x64] sm:$0xf0] }
 0x126   :  { %v301_v61 = vpop.f32.mrf.mxu0 }
 0x127   :  { %v411_v27 = vpack.c.bf16 %v301_v61, %v299_v58  ;;  %v1145_v58 = vor.u32 %v1206_v56, %v1142_v57  ;;  %v1186_v61 = vld [vmem:[%s1684_s0 + $0x44] sm:$0xf] }
 0x129   :  { %583 = vmatpush.bf16.msra.mxu1 %v406_v41  ;;  %1222 = vmatpush.bf16.msrb.mxu3 %v406_v41  ;;  %v1060_v41 = vld [vmem:[%s1684_s0 + $0x40] sm:$0xf] }
 0x12d   :  { %584 = vmatpush.bf16.msra.mxu1 %v405_v35  ;;  %1223 = vmatpush.bf16.msrb.mxu3 %v405_v35  ;;  %v1038_v35 = vld [vmem:[%s1684_s0 + $0x18] sm:$0xf0] }
 0x12e   :  { %v304_v62 = vpop.f32.mrf.mxu0  ;;  %v1041_v37 = vor.u32 %v1180_v34, %v1038_v35  ;;  %v1199_v34 = vld [vmem:[%s1684_s0 + $0xa4] sm:$0xf0] }
 0x131   :  { %585 = vmatpush.bf16.msra.mxu1 %v404_v29  ;;  %1224 = vmatpush.bf16.msrb.mxu3 %v404_v29  ;;  %v1148_v29 = vld [vmem:[%s1684_s0 + $0xf0] sm:$0xf] }
 0x132   :  { %v1149_v31 = vor.u32 %v1209_v30, %v1148_v29  ;;  %v1194_v30 = vld [vmem:[%s1684_s0 + $0x84] sm:$0xf] }
 0x135   :  { %586 = vmatpush.bf16.msra.mxu1 %v403_v23  ;;  %1225 = vmatpush.bf16.msrb.mxu3 %v403_v23  ;;  %v1183_v23 = vld [vmem:[%s1684_s0 + $0x24] sm:$0xf0] }
 0x136   :  { %v306_v63 = vpop.f32.mrf.mxu0  ;;  %v1045_v26 = vor.u32 %v1183_v23, %v1044_v22 }
 0x137   :  { %v412_v21 = vpack.c.bf16 %v306_v63, %v304_v62  ;;  %v1062_v62 = vld [vmem:[%s1684_s0 + $0x48] sm:$0xf0]  ;;  %v1077_v63 = vor.u32 %v1191_v60, %v1076_v59  ;;  %v1198_v59 = vld [vmem:[%s1684_s0 + $0xa4] sm:$0xf] }
 0x138   :  { %647 = vmatmul.bf16.vlgmr.msrb.gmra.mxu3 %v1125_v3  ;;  %587 = vmatmul.bf16.vlgmr.msra.gmra.mxu1 %v1029_v6  ;;  %v1065_v0 = vor.u32 %v1186_v61, %v1062_v62  ;;  %v1188_v6 = vld [vmem:[%s1684_s0 + $0x54] sm:$0xf]  ;;  %v1110_v60 = vld [vmem:[%s1684_s0 + $0xa8] sm:$0xf0] }
 0x139   :  { %1226 = vmatpush.bf16.msra.mxu3 %v418_v45  ;;  %v1061_v45 = vor.u32 %v1187_v42, %v1060_v41 }
 0x13d   :  { %1227 = vmatpush.bf16.msra.mxu3 %v417_v46  ;;  %v1049_v46 = vor.u32 %v1182_v43, %v1046_v44  ;;  %v1196_v44 = vld [vmem:[%s1684_s0 + $0x94] sm:$0xf] }
 0x13e   :  { %v309_v2 = vpop.f32.mrf.mxu0 }
 0x141   :  { %1228 = vmatpush.bf16.msra.mxu3 %v416_v48  ;;  %v1134_v48 = vld [vmem:[%s1684_s0 + $0xd8] sm:$0xf0] }
 0x145   :  { %1229 = vmatpush.bf16.msra.mxu3 %v415_v49  ;;  %v1137_v49 = vor.u32 %v1204_v47, %v1134_v48  ;;  %v1116_v47 = vld [vmem:[%s1684_s0 + $0xb0] sm:$0xf]  ;;  %v1201_v48 = vld [vmem:[%s1684_s0 + $0xb4] sm:$0xf0] }
 0x146   :  { %v311_v7 = vpop.f32.mrf.mxu0  ;;  %v1117_v52 = vor.u32 %v1201_v48, %v1116_v47 }
 0x147   :  { %v413_v19 = vpack.c.bf16 %v311_v7, %v309_v2  ;;  %v1150_v2 = vld [vmem:[%s1684_s0 + $0xf8] sm:$0xf0] }
 0x148   :  { %652 = vmatmul.bf16.gmra.mxu3 %v1133_v10  ;;  %592 = vmatmul.bf16.gmra.mxu1 %v1037_v14  ;;  %v1153_v3 = vor.u32 %v1208_v1, %v1150_v2  ;;  %v1070_v7 = vld [vmem:[%s1684_s0 + $0x58] sm:$0xf0]  ;;  %v1092_v10 = vld [vmem:[%s1684_s0 + $0x80] sm:$0xf] }
 0x149   :  { %v1073_v9 = vor.u32 %v1188_v6, %v1070_v7 }
 0x14e   :  { %v314_v11 = vpop.f32.mrf.mxu0 }
 0x156   :  { %v316_v15 = vpop.f32.mrf.mxu0 }
 0x157   :  { %v414_v16 = vpack.c.bf16 %v316_v15, %v314_v11  ;;  %v1195_v11 = vld [vmem:[%s1684_s0 + $0x84] sm:$0xf0] }
 0x158   :  { %657 = vmatmul.bf16.gmra.mxu3 %v1141_v20  ;;  %597 = vmatmul.bf16.gmra.mxu1 %v1045_v26  ;;  %v1093_v14 = vor.u32 %v1195_v11, %v1092_v10  ;;  %v1192_v20 = vld [vmem:[%s1684_s0 + $0x74] sm:$0xf] }
 0x159   :  { %672 = vmatpush.bf16.msra.mxu2 %v414_v16  ;;  %1230 = vmatpush.bf16.msra.mxu3 %v414_v16  ;;  %v1200_v11 = vld [vmem:[%s1684_s0 + $0xb4] sm:$0xf] }
 0x15d   :  { %673 = vmatpush.bf16.msra.mxu2 %v413_v19  ;;  %1231 = vmatpush.bf16.msra.mxu3 %v413_v19 }
 0x161   :  { %674 = vmatpush.bf16.msra.mxu2 %v412_v21  ;;  %1232 = vmatpush.bf16.msra.mxu3 %v412_v21  ;;  %v1086_v21 = vld [vmem:[%s1684_s0 + $0x78] sm:$0xf0] }
 0x162   :  { %v1089_v26 = vor.u32 %v1192_v20, %v1086_v21 }
 0x165   :  { %675 = vmatpush.bf16.msra.mxu2 %v411_v27  ;;  %1233 = vmatpush.bf16.msra.mxu3 %v411_v27  ;;  %v1101_v27 = vor.u32 %v1197_v25, %v1100_v24 }
 0x168   :  { %676 = vmatmul.bf16.vlgmr.msra.gmra.mxu2 %v1033_v28  ;;  %662 = vmatmul.bf16.gmra.mxu3 %v1149_v31  ;;  %v1094_v31 = vld [vmem:[%s1684_s0 + $0x88] sm:$0xf0] }
 0x169   :  { %602 = vmatmul.bf16.gmra.mxu1 %v1053_v36  ;;  %v1097_v35 = vor.u32 %v1194_v30, %v1094_v31  ;;  %v1109_v36 = vor.u32 %v1199_v34, %v1108_v33 }
 0x178   :  { %681 = vmatmul.bf16.gmra.mxu2 %v1041_v37  ;;  %736 = vmatmul.bf16.vlgmr.msra.gmra.mxu3 %v1129_v40  ;;  %v1514_v40 = vld [vmem:[%s1685_s3] ss:$0 sm:$0xff] }
 0x179   :  { %607 = vmatmul.bf16.gmra.mxu1 %v1061_v45  ;;  %v1102_v45 = vld [vmem:[%s1684_s0 + $0x98] sm:$0xf0] }
 0x17a   :  { %v1105_v50 = vor.u32 %v1196_v44, %v1102_v45 }
 0x188   :  { %686 = vmatmul.bf16.gmra.mxu2 %v1049_v46  ;;  %741 = vmatmul.bf16.gmra.mxu3 %v1137_v49 }
 0x189   :  { %612 = vmatmul.bf16.gmra.mxu1 %v1069_v54 }
 0x198   :  { %691 = vmatmul.bf16.gmra.mxu2 %v1057_v55  ;;  %746 = vmatmul.bf16.gmra.mxu3 %v1145_v58 }
 0x199   :  { %617 = vmatmul.bf16.gmra.mxu1 %v1077_v63 }
 0x1a8   :  { %696 = vmatmul.bf16.gmra.mxu2 %v1065_v0  ;;  %751 = vmatmul.bf16.gmra.mxu3 %v1153_v3  ;;  %v1113_v0 = vor.u32 %v1198_v59, %v1110_v60 }
 0x1a9   :  { %622 = vmatmul.bf16.gmra.mxu1 %v1085_v8 }
 0x1b5   :  { %v588_v15 = vpop.f32.mrf.mxu1 }
 0x1b8   :  { %701 = vmatmul.bf16.gmra.mxu2 %v1073_v9 }
 0x1b9   :  { %627 = vmatmul.bf16.gmra.mxu1 %v1093_v14 }
 0x1bb   :  { %v1477_v16 = vpop.f32.mrf.mxu3 }
 0x1bd   :  { %v590_v18 = vpop.f32.mrf.mxu1 }
 0x1c3   :  { %v1479_v19 = vpop.f32.mrf.mxu3 }
 0x1c5   :  { %v593_v22 = vpop.f32.mrf.mxu1 }
 0x1c8   :  { %706 = vmatmul.bf16.gmra.mxu2 %v1081_v17 }
 0x1c9   :  { %632 = vmatmul.bf16.gmra.mxu1 %v1101_v27 }
 0x1cb   :  { %v1487_v23 = vpop.f32.mrf.mxu3 }
 0x1cd   :  { %v595_v28 = vpop.f32.mrf.mxu1 }
 0x1d3   :  { %v1495_v29 = vpop.f32.mrf.mxu3 }
 0x1d5   :  { %v598_v37 = vpop.f32.mrf.mxu1 }
 0x1d8   :  { %711 = vmatmul.bf16.gmra.mxu2 %v1089_v26 }
 0x1d9   :  { %637 = vmatmul.bf16.gmra.mxu1 %v1109_v36 }
 0x1db   :  { %v1503_v32 = vpop.f32.mrf.mxu3 }
 0x1dd   :  { %v600_v42 = vpop.f32.mrf.mxu1 }
 0x1e3   :  { %v1516_v41 = vpop.f32.mrf.mxu3 }
 0x1e6   :  { %v603_v54 = vpop.f32.mrf.mxu1 }
 0x1e8   :  { %716 = vmatmul.bf16.gmra.mxu2 %v1097_v35 }
 0x1e9   :  { %642 = vmatmul.bf16.gmra.mxu1 %v1117_v52 }
 0x1eb   :  { %v677_v38 = vpop.f32.mrf.mxu2  ;;  %v1534_v51 = vpop.f32.mrf.mxu3 }
 0x1ec   :  { %v678_v39 = vadd.f32 %v677_v38, %v588_v15 }
 0x1ee   :  { %v860_v43 = vadd.f32 %v1514_v40, %v678_v39  ;;  %v605_v62 = vpop.f32.mrf.mxu1 }
 0x1f0   :  { %892 = vst [vmem:[%s1686_s4] sm:$0xff] %v860_v43 }
 0x1f3   :  { %v679_v46 = vpop.f32.mrf.mxu2  ;;  %v1540_v57 = vpop.f32.mrf.mxu3 }
 0x1f4   :  { %v680_v49 = vadd.f32 %v679_v46, %v590_v18 }
 0x1f6   :  { %v861_v53 = vadd.f32 %v1514_v40, %v680_v49  ;;  %v608_v7 = vpop.f32.mrf.mxu1 }
 0x1f8   :  { %721 = vmatmul.bf16.gmra.mxu2 %v1105_v50  ;;  %893 = vst [vmem:[%s1686_s4 + $0x8] sm:$0xff] %v861_v53 }
 0x1fb   :  { %v682_v55 = vpop.f32.mrf.mxu2  ;;  %v737_v1 = vpop.f32.mrf.mxu3 }
 0x1fc   :  { %v683_v56 = vadd.f32 %v682_v55, %v593_v22  ;;  %v738_v3 = vadd.f32 %v737_v1, %v1477_v16  ;;  %v1121_v16 = vor.u32 %v1200_v11, %v1118_v12 }
 0x1fe   :  { %v862_v58 = vadd.f32 %v1514_v40, %v683_v56  ;;  %v884_v9 = vadd.f32 %v1514_v40, %v738_v3  ;;  %v610_v18 = vpop.f32.mrf.mxu1 }
 0x200   :  { %894 = vst [vmem:[%s1686_s4 + $0x10] sm:$0xff] %v862_v58 }
 0x201   :  { %916 = vst [vmem:[%s1686_s4 + $0xc0] sm:$0xff] %v884_v9 }
 0x203   :  { %v684_v61 = vpop.f32.mrf.mxu2  ;;  %v739_v6 = vpop.f32.mrf.mxu3 }
 0x204   :  { %v685_v63 = vadd.f32 %v684_v61, %v595_v28  ;;  %v740_v8 = vadd.f32 %v739_v6, %v1479_v19 }
 0x206   :  { %v863_v2 = vadd.f32 %v1514_v40, %v685_v63  ;;  %v885_v13 = vadd.f32 %v1514_v40, %v740_v8  ;;  %v613_v28 = vpop.f32.mrf.mxu1 }
 0x208   :  { %726 = vmatmul.bf16.gmra.mxu2 %v1113_v0  ;;  %895 = vst [vmem:[%s1686_s4 + $0x18] sm:$0xff] %v863_v2 }
 0x209   :  { %917 = vst [vmem:[%s1686_s4 + $0xc8] sm:$0xff] %v885_v13 }
 0x20b   :  { %v687_v4 = vpop.f32.mrf.mxu2  ;;  %v742_v17 = vpop.f32.mrf.mxu3 }
 0x20c   :  { %v688_v5 = vadd.f32 %v687_v4, %v598_v37  ;;  %v743_v20 = vadd.f32 %v742_v17, %v1487_v23 }
 0x20e   :  { %v864_v10 = vadd.f32 %v1514_v40, %v688_v5  ;;  %v886_v26 = vadd.f32 %v1514_v40, %v743_v20  ;;  %v615_v36 = vpop.f32.mrf.mxu1 }
 0x210   :  { %896 = vst [vmem:[%s1686_s4 + $0x20] sm:$0xff] %v864_v10 }
 0x211   :  { %918 = vst [vmem:[%s1686_s4 + $0xd0] sm:$0xff] %v886_v26 }
 0x213   :  { %v689_v14 = vpop.f32.mrf.mxu2  ;;  %v744_v24 = vpop.f32.mrf.mxu3 }
 0x214   :  { %v690_v15 = vadd.f32 %v689_v14, %v600_v42  ;;  %v745_v25 = vadd.f32 %v744_v24, %v1495_v29 }
 0x216   :  { %v865_v19 = vadd.f32 %v1514_v40, %v690_v15  ;;  %v887_v30 = vadd.f32 %v1514_v40, %v745_v25  ;;  %v618_v46 = vpop.f32.mrf.mxu1 }
 0x218   :  { %731 = vmatmul.bf16.gmra.mxu2 %v1121_v16  ;;  %897 = vst [vmem:[%s1686_s4 + $0x28] sm:$0xff] %v865_v19 }
 0x219   :  { %919 = vst [vmem:[%s1686_s4 + $0xd8] sm:$0xff] %v887_v30 }
 0x21b   :  { %v692_v21 = vpop.f32.mrf.mxu2  ;;  %v747_v31 = vpop.f32.mrf.mxu3 }
 0x21c   :  { %v693_v22 = vadd.f32 %v692_v21, %v603_v54  ;;  %v748_v34 = vadd.f32 %v747_v31, %v1503_v32 }
 0x21e   :  { %v866_v27 = vadd.f32 %v1514_v40, %v693_v22  ;;  %v888_v42 = vadd.f32 %v1514_v40, %v748_v34  ;;  %v620_v55 = vpop.f32.mrf.mxu1 }
 0x220   :  { %898 = vst [vmem:[%s1686_s4 + $0x30] sm:$0xff] %v866_v27 }
 0x221   :  { %920 = vst [vmem:[%s1686_s4 + $0xe0] sm:$0xff] %v888_v42 }
 0x223   :  { %v694_v23 = vpop.f32.mrf.mxu2  ;;  %v749_v38 = vpop.f32.mrf.mxu3 }
 0x224   :  { %v695_v29 = vadd.f32 %v694_v23, %v605_v62  ;;  %v750_v39 = vadd.f32 %v749_v38, %v1516_v41 }
 0x226   :  { %v867_v33 = vadd.f32 %v1514_v40, %v695_v29  ;;  %v889_v44 = vadd.f32 %v1514_v40, %v750_v39  ;;  %v623_v60 = vpop.f32.mrf.mxu1 }
 0x228   :  { %899 = vst [vmem:[%s1686_s4 + $0x38] sm:$0xff] %v867_v33 }
 0x229   :  { %921 = vst [vmem:[%s1686_s4 + $0xe8] sm:$0xff] %v889_v44 }
 0x22b   :  { %v697_v35 = vpop.f32.mrf.mxu2  ;;  %v752_v45 = vpop.f32.mrf.mxu3 }
 0x22c   :  { %v698_v37 = vadd.f32 %v697_v35, %v608_v7  ;;  %v753_v48 = vadd.f32 %v752_v45, %v1534_v51 }
 0x22e   :  { %v868_v43 = vadd.f32 %v1514_v40, %v698_v37  ;;  %v890_v54 = vadd.f32 %v1514_v40, %v753_v48  ;;  %v625_v1 = vpop.f32.mrf.mxu1 }
 0x230   :  { %900 = vst [vmem:[%s1686_s4 + $0x40] sm:$0xff] %v868_v43 }
 0x231   :  { %922 = vst [vmem:[%s1686_s4 + $0xf0] sm:$0xff] %v890_v54 }
 0x233   :  { %v699_v32 = vpop.f32.mrf.mxu2  ;;  %v754_v52 = vpop.f32.mrf.mxu3 }
 0x234   :  { %v700_v41 = vadd.f32 %v699_v32, %v610_v18  ;;  %v755_v53 = vadd.f32 %v754_v52, %v1540_v57 }
 0x236   :  { %v869_v47 = vadd.f32 %v1514_v40, %v700_v41  ;;  %v891_v58 = vadd.f32 %v1514_v40, %v755_v53  ;;  %v628_v6 = vpop.f32.mrf.mxu1 }
 0x238   :  { %901 = vst [vmem:[%s1686_s4 + $0x48] sm:$0xff] %v869_v47 }
 0x239   :  { %923 = vst [vmem:[%s1686_s4 + $0xf8] sm:$0xff] %v891_v58 }
 0x23b   :  { %v702_v49 = vpop.f32.mrf.mxu2 }
 0x23c   :  { %v703_v50 = vadd.f32 %v702_v49, %v613_v28 }
 0x23e   :  { %v870_v56 = vadd.f32 %v1514_v40, %v703_v50  ;;  %v630_v10 = vpop.f32.mrf.mxu1 }
 0x240   :  { %902 = vst [vmem:[%s1686_s4 + $0x50] sm:$0xff] %v870_v56 }
 0x243   :  { %v704_v51 = vpop.f32.mrf.mxu2 }
 0x244   :  { %v705_v57 = vadd.f32 %v704_v51, %v615_v36 }
 0x246   :  { %v871_v59 = vadd.f32 %v1514_v40, %v705_v57  ;;  %v633_v15 = vpop.f32.mrf.mxu1 }
 0x248   :  { %903 = vst [vmem:[%s1686_s4 + $0x58] sm:$0xff] %v871_v59 }
 0x24b   :  { %v707_v61 = vpop.f32.mrf.mxu2 }
 0x24c   :  { %v708_v62 = vadd.f32 %v707_v61, %v618_v46 }
 0x24e   :  { %v872_v63 = vadd.f32 %v1514_v40, %v708_v62  ;;  %v635_v19 = vpop.f32.mrf.mxu1 }
 0x250   :  { %904 = vst [vmem:[%s1686_s4 + $0x60] sm:$0xff] %v872_v63 }
 0x253   :  { %v709_v0 = vpop.f32.mrf.mxu2 }
 0x254   :  { %v710_v2 = vadd.f32 %v709_v0, %v620_v55 }
 0x256   :  { %v873_v3 = vadd.f32 %v1514_v40, %v710_v2  ;;  %v638_v26 = vpop.f32.mrf.mxu1 }
 0x258   :  { %905 = vst [vmem:[%s1686_s4 + $0x68] sm:$0xff] %v873_v3 }
 0x25b   :  { %v712_v4 = vpop.f32.mrf.mxu2 }
 0x25c   :  { %v713_v5 = vadd.f32 %v712_v4, %v623_v60 }
 0x25e   :  { %v874_v7 = vadd.f32 %v1514_v40, %v713_v5  ;;  %v640_v23 = vpop.f32.mrf.mxu1 }
 0x260   :  { %906 = vst [vmem:[%s1686_s4 + $0x70] sm:$0xff] %v874_v7 }
 0x263   :  { %v714_v8 = vpop.f32.mrf.mxu2 }
 0x264   :  { %v715_v9 = vadd.f32 %v714_v8, %v625_v1 }
 0x266   :  { %v875_v11 = vadd.f32 %v1514_v40, %v715_v9  ;;  %v643_v35 = vpop.f32.mrf.mxu1 }
 0x268   :  { %907 = vst [vmem:[%s1686_s4 + $0x78] sm:$0xff] %v875_v11 }
 0x26b   :  { %v717_v12 = vpop.f32.mrf.mxu2 }
 0x26c   :  { %v718_v13 = vadd.f32 %v717_v12, %v628_v6 }
 0x26e   :  { %v876_v14 = vadd.f32 %v1514_v40, %v718_v13  ;;  %v645_v39 = vpop.f32.mrf.mxu1 }
 0x270   :  { %908 = vst [vmem:[%s1686_s4 + $0x80] sm:$0xff] %v876_v14 }
 0x273   :  { %v719_v16 = vpop.f32.mrf.mxu2 }
 0x274   :  { %v720_v17 = vadd.f32 %v719_v16, %v630_v10 }
 0x276   :  { %v877_v18 = vadd.f32 %v1514_v40, %v720_v17 }
 0x278   :  { %909 = vst [vmem:[%s1686_s4 + $0x88] sm:$0xff] %v877_v18 }
 0x27b   :  { %v722_v20 = vpop.f32.mrf.mxu2 }
 0x27c   :  { %v723_v21 = vadd.f32 %v722_v20, %v633_v15 }
 0x27e   :  { %v878_v22 = vadd.f32 %v1514_v40, %v723_v21 }
 0x280   :  { %910 = vst [vmem:[%s1686_s4 + $0x90] sm:$0xff] %v878_v22 }
 0x283   :  { %v724_v24 = vpop.f32.mrf.mxu2 }
 0x284   :  { %v725_v25 = vadd.f32 %v724_v24, %v635_v19 }
 0x286   :  { %v879_v27 = vadd.f32 %v1514_v40, %v725_v25 }
 0x288   :  { %911 = vst [vmem:[%s1686_s4 + $0x98] sm:$0xff] %v879_v27 }
 0x28b   :  { %v727_v28 = vpop.f32.mrf.mxu2 }
 0x28c   :  { %v728_v30 = vadd.f32 %v727_v28, %v638_v26 }
 0x28e   :  { %v880_v29 = vadd.f32 %v1514_v40, %v728_v30 }
 0x290   :  { %912 = vst [vmem:[%s1686_s4 + $0xa0] sm:$0xff] %v880_v29 }
 0x293   :  { %v729_v31 = vpop.f32.mrf.mxu2 }
 0x294   :  { %v730_v33 = vadd.f32 %v729_v31, %v640_v23 }
 0x296   :  { %v881_v34 = vadd.f32 %v1514_v40, %v730_v33 }
 0x298   :  { %913 = vst [vmem:[%s1686_s4 + $0xa8] sm:$0xff] %v881_v34 }
 0x29b   :  { %v732_v36 = vpop.f32.mrf.mxu2 }
 0x29c   :  { %v733_v37 = vadd.f32 %v732_v36, %v643_v35 }
 0x29e   :  { %v882_v38 = vadd.f32 %v1514_v40, %v733_v37 }
 0x2a0   :  { %914 = vst [vmem:[%s1686_s4 + $0xb0] sm:$0xff] %v882_v38 }
 0x2a3   :  { %v734_v42 = vpop.f32.mrf.mxu2 }
 0x2a4   :  { %v735_v43 = vadd.f32 %v734_v42, %v645_v39 }
 0x2a6   :  { %v883_v44 = vadd.f32 %v1514_v40, %v735_v43 }
 0x2a8   :  { %915 = vst [vmem:[%s1686_s4 + $0xb8] sm:$0xff] %v883_v44 }

</bundles_post_ra>
